<compile_context>
chip_gen: v5e
topology: v5e:2x2
jax: 0.10.0
libtpu: 0.0.40
codegen_flags: <defaults>
</compile_context>

<pallas_src>
import functools

import jax
import jax.numpy as jnp
from jax import lax
from jax.experimental import pallas as pl
from jax.experimental.pallas import tpu as pltpu


# --------------------------------------------------------------------------- #
# Per-generation VMEM sizing
# --------------------------------------------------------------------------- #
def _vmem_config():
    """Returns (per-grid-step working-set budget, scoped-VMEM limit to request)."""
    kind = ""
    try:
        kind = jax.devices()[0].device_kind.lower()
    except Exception:
        pass
    if ("v2" in kind) or ("v3" in kind):        # small physical VMEM: keep compiler defaults
        return 10 << 20, None
    if ("v5" in kind) or ("v6" in kind):        # 128 MiB physical VMEM on the single core
        return 64 << 20, 100 << 20
    # v7x (64 MiB per TensorCore) and unknown chips: conservative
    return 26 << 20, 52 << 20


# --------------------------------------------------------------------------- #
# Kernel 1: fused per-sample PCA
#   center over channels -> trace-normalized Gram (MXU) -> top-3 eigenpairs via
#   accelerated (G^2) subspace iteration -> svd_flip sign + sigma scaling ->
#   fused F.normalize over the concatenated 3C feature vector.
#   x block:   (TB, C, S)   per sample: single_tensor.T in the torch helper
#   out block: (TB, 3, C)   row k == normalized PCA component-k scores over C channels
# --------------------------------------------------------------------------- #
def _pca_top3_kernel(x_ref, v0_ref, out_ref, *, ndouble, gram_dtype):
    x = x_ref[...]
    tb, c_dim, _ = x.shape

    xf = x.astype(jnp.float32)
    mean = jnp.mean(xf, axis=1, keepdims=True)            # mean over the C "samples" axis
    xc = xf - mean

    # Trace-normalize the Gram so its eigenvalues are <= 1: keeps the accelerated
    # (G^2) power iteration safely inside f32 range.  trace(G) == ||xc||_F^2.
    ssq = jnp.sum(jnp.sum(xc * xc, axis=-1, keepdims=True), axis=1, keepdims=True)  # (tb,1,1)
    inv_ssq = 1.0 / jnp.maximum(ssq, jnp.float32(1e-30))

    # Gram over the spatial axis.  bf16 inputs keep a bf16 MXU pass (f32 accumulation):
    # f32xf32 is multi-pass on the MXU and this matmul dominates the kernel's FLOPs.
    xmm = xc.astype(gram_dtype)
    g = jnp.einsum("bcs,bds->bcd", xmm, xmm,
                   preferred_element_type=jnp.float32) * inv_ssq      # (tb, C, C), eig <= 1

    def rdot(u, v):                                       # lane-axis row dot product
        return jnp.sum(u * v, axis=-1, keepdims=True)

    def unitn(v):                                         # EUP rsqrt; also return ||v||^2
        n = rdot(v, v)
        return v * lax.rsqrt(n + jnp.float32(1e-30)), n

    # Accelerated subspace (orthogonal) iteration: apply G twice per step (two small MXU
    # matmuls on the persistent (tb,3,C) block), then ONE modified Gram-Schmidt pass
    # ("GS every 2 power iterations").
    q0 = jnp.broadcast_to(v0_ref[...][None].astype(jnp.float32), (tb, 3, c_dim))
    ones = jnp.ones((tb, 1, 1), jnp.float32)

    def body(_, carry):
        q = carry[0]
        w = jnp.einsum("bmc,bcd->bmd", q, g, preferred_element_type=jnp.float32)
        w = jnp.einsum("bmc,bcd->bmd", w, g, preferred_element_type=jnp.float32)
        w1, w2, w3 = w[:, 0:1, :], w[:, 1:2, :], w[:, 2:3, :]
        a, n1 = unitn(w1)
        w2 = w2 - rdot(a, w2) * a
        b, n2 = unitn(w2)
        w3 = w3 - rdot(a, w3) * a
        w3 = w3 - rdot(b, w3) * b
        c, n3 = unitn(w3)
        return jnp.concatenate([a, b, c], axis=1), n1, n2, n3

    q, n1, n2, n3 = lax.fori_loop(0, ndouble, body, (q0, ones, ones, ones), unroll=True)

    # Eigenvalues folded out of the loop: at convergence ||G^2 q_k|| = lam_k^2 (G is the
    # trace-normalized Gram), so lam_k = n_k^(1/4) and sigma_k = sqrt(ssq * lam_k).
    n = jnp.concatenate([n1, n2, n3], axis=1)             # (tb, 3, 1)
    lam = jnp.sqrt(jnp.sqrt(n))
    sig = jnp.sqrt(ssq * lam)                             # singular values sigma_k

    # sklearn svd_flip (u-based): make the max-|u| entry positive (first index on ties).
    lane = lax.broadcasted_iota(jnp.int32, (tb, 3, c_dim), 2)
    aq = jnp.abs(q)
    mx = jnp.max(aq, axis=-1, keepdims=True)
    idx = jnp.min(jnp.where(aq >= mx, lane, c_dim), axis=-1, keepdims=True)
    picked = jnp.sum(jnp.where(lane == idx, q, 0.0), axis=-1, keepdims=True)
    sign = jnp.where(picked >= 0.0, jnp.float32(1.0), jnp.float32(-1.0))

    # Fused F.normalize(cat(comp0,comp1,comp2), dim=-1): ||feat||^2 == sum_k sigma_k^2.
    normsq = jnp.sum(ssq * lam, axis=1, keepdims=True)                 # (tb, 1, 1)
    inv_norm = lax.rsqrt(jnp.maximum(normsq, jnp.float32(1e-24)))      # eps=1e-12 on the norm

    out_ref[...] = (q * (sign * sig * inv_norm)).astype(out_ref.dtype)


def _pca_block_features(x_bcs, *, ndouble=8):
    """x_bcs: (B, C, S) -> (B, 3*C) f32, rows already L2-normalized.

    == F.normalize(cat(heat[:,:,0], heat[:,:,1], heat[:,:,2]), dim=-1) of the torch code,
    with the per-sample PCA approximated by 2*ndouble accelerated power-iteration steps."""
    B, C, S = x_bcs.shape

    # Lane-dense spatial axis: zero-pad S to a multiple of 128.  Exact: padded columns
    # have zero channel-mean and contribute nothing to the centered Gram.
    s_pad = max(128, ((S + 127) // 128) * 128)
    if s_pad != S:
        x_bcs = jnp.pad(x_bcs, ((0, 0), (0, 0), (0, s_pad - S)))

    in_dt = jnp.dtype(x_bcs.dtype)
    use_bf16 = in_dt in (jnp.dtype(jnp.bfloat16), jnp.dtype(jnp.float16))
    gram_dtype = jnp.bfloat16 if use_bf16 else jnp.float32
    in_bytes = in_dt.itemsize

    # Samples per grid step, sized against this generation's VMEM: double-buffered
    # native-dtype input + f32 centered copy (+ bf16 matmul copy) + resident Gram + loop state.
    budget, vmem_limit = _vmem_config()
    per_sample = (C * s_pad * (2 * in_bytes + 8 + (2 if use_bf16 else 0))
                  + 4 * C * C + 64 * C)
    tb = max(1, min(B, budget // per_sample))
    # >= 4 grid steps where the batch allows: 2+ steps per TensorCore under v7x megacore so
    # the BlockSpec double-buffer pipeline actually overlaps DMA with compute on both cores.
    min_blocks = 4 if B >= 4 else B
    tb = max(1, min(tb, max(1, B // min_blocks)))
    nblocks = pl.cdiv(B, tb)
    bp = nblocks * tb
    if bp != B:                       # zero-padded samples produce zero rows, sliced off below
        x_bcs = jnp.pad(x_bcs, ((0, bp - B), (0, 0), (0, 0)))

    # Fixed (data-independent) init for the iterated 3-dim subspace.
    v0 = jax.random.normal(jax.random.PRNGKey(42), (3, C), dtype=jnp.float32)

    flops = 2 * bp * C * C * s_pad + 4 * (2 * ndouble) * bp * 3 * C * C
    bytes_accessed = bp * C * s_pad * in_bytes + bp * 3 * C * 4 + 3 * C * 4

    out = pl.pallas_call(
        functools.partial(_pca_top3_kernel, ndouble=ndouble, gram_dtype=gram_dtype),
        out_shape=jax.ShapeDtypeStruct((bp, 3, C), jnp.float32),
        grid=(nblocks,),
        in_specs=[
            pl.BlockSpec((tb, C, s_pad), lambda b: (b, 0, 0)),
            pl.BlockSpec((3, C), lambda b: (0, 0)),
        ],
        out_specs=pl.BlockSpec((tb, 3, C), lambda b: (b, 0, 0)),
        compiler_params=pltpu.CompilerParams(
            dimension_semantics=("parallel",),
            vmem_limit_bytes=vmem_limit),
        cost_estimate=pl.CostEstimate(
            flops=int(flops),
            transcendentals=int(bp * (3 * ndouble + 16)),
            bytes_accessed=int(bytes_accessed)),
    )(x_bcs, v0)

    # (B, 3, C) row-major == [comp0(C) | comp1(C) | comp2(C)] -> torch's cat is a free reshape.
    return out[:B].reshape(B, 3 * C)


# --------------------------------------------------------------------------- #
# Kernel 2: one-sided cross-entropy sum over row blocks (inputs pre-normalized)
#   accumulates  sum_i [ logsumexp_j(scale * <a_i, b_j>) - scale * <a_i, b_i> ]
# --------------------------------------------------------------------------- #
def _ce_rows_body(scale_ref, a_ref, b_ref, out_ref, *, tq, n_rows, n_cols, n_cols_pad):
    i = pl.program_id(0)

    @pl.when(i == 0)
    def _():
        out_ref[...] = jnp.zeros_like(out_ref)

    scale = scale_ref[0]
    r0 = pl.multiple_of(i * tq, 8)
    a_blk = a_ref[pl.ds(r0, tq), :]                        # (tq, D) query rows
    b_blk = b_ref[pl.ds(r0, tq), :]                        # (tq, D) rows pairing the diagonal

    logits = scale * lax.dot_general(
        a_blk, b_ref[...], (((1,), (1,)), ((), ())),
        preferred_element_type=jnp.float32)                # (tq, n_cols_pad)
    if n_cols_pad > n_cols:   # static: mask zero-padded key rows out of the logsumexp
        col = lax.broadcasted_iota(jnp.int32, logits.shape, 1)
        logits = jnp.where(col < n_cols, logits, jnp.float32(-1e30))

    # diag(logits) without iota/eye masks: a row-wise dot product.
    diag = scale * jnp.sum(a_blk * b_blk, axis=-1, keepdims=True)      # (tq, 1)

    m = jnp.max(logits, axis=-1, keepdims=True)                        # lane-axis reductions
    lse = m + jnp.log(jnp.sum(jnp.exp(logits - m), axis=-1, keepdims=True))

    rid = i * tq + lax.broadcasted_iota(jnp.int32, (tq, 1), 0)
    contrib = jnp.where(rid < n_rows, lse - diag, 0.0)                 # mask padded query rows
    out_ref[...] += jnp.sum(contrib)


def _ce_rows_kernel(scale_ref, a_ref, b_ref, out_ref, **kw):
    _ce_rows_body(scale_ref, a_ref, b_ref, out_ref, **kw)


def _ce_rows_sym_kernel(scale_ref, ab_ref, out_ref, **kw):
    # Symmetric case: one resident matrix plays both the query and the key role.
    _ce_rows_body(scale_ref, ab_ref, ab_ref, out_ref, **kw)


def _ce_sum(a, b, scale_arr, vmem_limit):
    """sum_i [logsumexp_j(scale*<a_i,b_j>) - scale*<a_i,b_i>].  b=None -> b := a (symmetric)."""
    B, D = a.shape
    tq = min(256, ((B + 7) // 8) * 8)
    nb = pl.cdiv(B, tq)
    bp = nb * tq
    if bp != B:
        a = jnp.pad(a, ((0, bp - B), (0, 0)))
        if b is not None:
            b = jnp.pad(b, ((0, bp - B), (0, 0)))

    kw = dict(tq=tq, n_rows=B, n_cols=B, n_cols_pad=bp)
    full_spec = pl.BlockSpec((bp, D), lambda i: (0, 0))    # constant index map: fetched once
    n_mats = 1 if b is None else 2
    cost = pl.CostEstimate(
        flops=int(2 * bp * bp * D + 8 * bp * bp + 2 * bp * D),
        transcendentals=int(bp * bp + 2 * bp),
        bytes_accessed=int(4 * (n_mats * bp * D + 1)))
    cp = pltpu.CompilerParams(dimension_semantics=("arbitrary",),
                              vmem_limit_bytes=vmem_limit)

    if b is None:
        kernel = functools.partial(_ce_rows_sym_kernel, **kw)
        in_specs = [pl.BlockSpec(memory_space=pltpu.MemorySpace.SMEM), full_spec]
        args = (scale_arr, a)
    else:
        kernel = functools.partial(_ce_rows_kernel, **kw)
        in_specs = [pl.BlockSpec(memory_space=pltpu.MemorySpace.SMEM), full_spec, full_spec]
        args = (scale_arr, a, b)

    out = pl.pallas_call(
        kernel,
        out_shape=jax.ShapeDtypeStruct((1, 1), jnp.float32),
        grid=(nb,),
        in_specs=in_specs,
        out_specs=pl.BlockSpec((1, 1), lambda i: (0, 0)),
        compiler_params=cp,
        cost_estimate=cost,
    )(*args)
    return out[0, 0]


def _infonce_loss(f1n, f2n, logit_scale, *, symmetric):
    """(CE(logits, arange) + CE(logits.T, arange)) / 2 with logits = scale * f1n @ f2n.T.
    f1n / f2n rows must already be L2-normalized (done inside the PCA kernel)."""
    B = f1n.shape[0]
    scale_arr = jnp.reshape(jnp.asarray(logit_scale, jnp.float32), (1,))
    _, vmem_limit = _vmem_config()
    if symmetric:
        # logits is symmetric -> CE(logits) == CE(logits.T): a single one-sided pass suffices.
        return _ce_sum(f1n, None, scale_arr, vmem_limit) / B
    t12 = _ce_sum(f1n, f2n, scale_arr, vmem_limit)
    t21 = _ce_sum(f2n, f1n, scale_arr, vmem_limit)   # column LSE via the transposed matmul
    return 0.5 * (t12 + t21) / B


# --------------------------------------------------------------------------- #
# Full forward (blocks_InfoNCE_PCA.forward, loss_function = CrossEntropyLoss)
# --------------------------------------------------------------------------- #
def blocks_infonce_pca_forward(image_features1, image_features2, logit_scale,
                               weights=None, blocks=3):
    del weights, blocks                            # unused by the reference forward path
    B, C, H, W = image_features1.shape
    S = H * W

    # torch: view(B,C,-1).transpose(-2,-1); the PCA helper transposes back to (C,S) per
    # sample -> the transposes cancel, feed (B, C, S) directly (reshape is free).
    fb1 = _pca_block_features(image_features1.reshape(B, C, S))

    # Reproduce the source bug: image_features2_flatten is also built from image_features1's
    # data, so the second PCA is bit-identical -> reuse it; the logits matrix is symmetric.
    b2, c2 = image_features2.shape[0], image_features2.shape[1]
    if (b2, c2) == (B, C):
        return _infonce_loss(fb1, fb1, logit_scale, symmetric=True)
    fb2 = _pca_block_features(image_features1.reshape(b2, c2, -1))
    return _infonce_loss(fb1, fb2, logit_scale, symmetric=False)


if __name__ == "__main__":
    key = jax.random.PRNGKey(0)
    k1, k2 = jax.random.split(key)

    B, C, H, W = 4, 8, 16, 16
    image_features1 = jax.random.normal(k1, (B, C, H, W), dtype=jnp.float32)
    image_features2 = jax.random.normal(k2, (B, C, H, W), dtype=jnp.float32)
    logit_scale = jnp.float32(1.0 / 0.07)          # CLIP-style temperature

    loss = blocks_infonce_pca_forward(image_features1, image_features2, logit_scale,
                                      weights=None, blocks=3)
    loss = jax.block_until_ready(loss)
    assert loss.shape == () and jnp.isfinite(loss)
    print("KERNEL_OK")
</pallas_src>

<mosaic_0001>
module attributes {stable_mosaic.version = 11 : i64} {
  func.func @_pca_top3_kernel(%arg0: i32, %arg1: memref<1x8x256xf32, #tpu.memory_space<vmem>>, %arg2: memref<3x8xf32, #tpu.memory_space<vmem>>, %arg3: memref<1x3x8xf32, #tpu.memory_space<vmem>>) attributes {dimension_semantics = [#tpu.dimension_semantics<parallel>], iteration_bounds = array<i64: 4>, scalar_prefetch = 0 : i64, scratch_operands = 0 : i64, tpu.core_type = #tpu.core_type<tc>, window_params = [{transform_indices = @transform_0, window_bounds = array<i64: 1, 8, 256>}, {pipeline_mode = #tpu.pipeline_mode<synchronous>, transform_indices = @transform_1, window_bounds = array<i64: 3, 8>}, {transform_indices = @transform_2, window_bounds = array<i64: 1, 3, 8>}]} {
    %c0 = arith.constant 0 : index
    %c0_0 = arith.constant 0 : index
    %c0_1 = arith.constant 0 : index
    %0 = vector.load %arg1[%c0, %c0_0, %c0_1] : memref<1x8x256xf32, #tpu.memory_space<vmem>>, vector<1x8x256xf32>
    %cst = arith.constant dense<0.000000e+00> : vector<1x256xf32>
    %1 = vector.multi_reduction <add>, %0, %cst [1] : vector<1x8x256xf32> to vector<1x256xf32>
    %2 = vector.shape_cast %1 : vector<1x256xf32> to vector<1x1x256xf32>
    %cst_2 = arith.constant 8.000000e+00 : f32
    %3 = vector.broadcast %cst_2 : f32 to vector<1x1x256xf32>
    %4 = arith.divf %2, %3 : vector<1x1x256xf32>
    %5 = vector.broadcast %4 : vector<1x1x256xf32> to vector<1x8x256xf32>
    %6 = arith.subf %0, %5 : vector<1x8x256xf32>
    %7 = arith.mulf %6, %6 : vector<1x8x256xf32>
    %cst_3 = arith.constant dense<0.000000e+00> : vector<1x8xf32>
    %8 = vector.multi_reduction <add>, %7, %cst_3 [2] : vector<1x8x256xf32> to vector<1x8xf32>
    %9 = vector.shape_cast %8 : vector<1x8xf32> to vector<1x8x1xf32>
    %cst_4 = arith.constant dense<0.000000e+00> : vector<1x1xf32>
    %10 = vector.multi_reduction <add>, %9, %cst_4 [1] : vector<1x8x1xf32> to vector<1x1xf32>
    %11 = vector.shape_cast %10 : vector<1x1xf32> to vector<1x1x1xf32>
    %cst_5 = arith.constant 1.000000e-30 : f32
    %12 = vector.broadcast %cst_5 : f32 to vector<1x1x1xf32>
    %13 = arith.maximumf %11, %12 : vector<1x1x1xf32>
    %cst_6 = arith.constant 1.000000e+00 : f32
    %14 = vector.broadcast %cst_6 : f32 to vector<1x1x1xf32>
    %15 = arith.divf %14, %13 : vector<1x1x1xf32>
    "tpu.trace_start"() <{level = 10 : i32, message = "bcs,bds->bcd"}> : () -> ()
    %cst_7 = arith.constant dense<0.000000e+00> : vector<1x8x8xf32>
    %16 = tpu.matmul %6, %6, %cst_7 {dimension_numbers = #tpu.dot_dimension_numbers<[2], [2], [1], [1], [0, 0, 0, 1, 1, 1], [0], [0]>} : vector<1x8x256xf32>, vector<1x8x256xf32>, vector<1x8x8xf32> -> vector<1x8x8xf32>
    "tpu.trace_stop"() : () -> ()
    %17 = vector.broadcast %15 : vector<1x1x1xf32> to vector<1x8x8xf32>
    %18 = arith.mulf %16, %17 : vector<1x8x8xf32>
    %c0_8 = arith.constant 0 : index
    %c0_9 = arith.constant 0 : index
    %19 = vector.load %arg2[%c0_8, %c0_9] : memref<3x8xf32, #tpu.memory_space<vmem>>, vector<3x8xf32>
    %20 = vector.shape_cast %19 : vector<3x8xf32> to vector<1x3x8xf32>
    %cst_10 = arith.constant 1.000000e+00 : f32
    %21 = vector.broadcast %cst_10 : f32 to vector<1x1x1xf32>
    %c0_i32 = arith.constant 0 : i32
    "tpu.trace_start"() <{level = 10 : i32, message = "bmc,bcd->bmd"}> : () -> ()
    %cst_11 = arith.constant dense<0.000000e+00> : vector<1x3x8xf32>
    %22 = tpu.matmul %20, %18, %cst_11 {dimension_numbers = #tpu.dot_dimension_numbers<[2], [1], [1], [2], [0, 0, 0, 1, 1, 2], [0], [0]>} : vector<1x3x8xf32>, vector<1x8x8xf32>, vector<1x3x8xf32> -> vector<1x3x8xf32>
    %cst_12 = arith.constant dense<0.000000e+00> : vector<1x3x8xf32>
    %23 = tpu.matmul %22, %18, %cst_12 {dimension_numbers = #tpu.dot_dimension_numbers<[2], [1], [1], [2], [0, 0, 0, 1, 1, 2], [0], [0]>} : vector<1x3x8xf32>, vector<1x8x8xf32>, vector<1x3x8xf32> -> vector<1x3x8xf32>
    "tpu.trace_stop"() : () -> ()
    %24 = vector.extract_strided_slice %23 {offsets = [0, 0, 0], sizes = [1, 1, 8], strides = [1, 1, 1]} : vector<1x3x8xf32> to vector<1x1x8xf32>
    %25 = vector.extract_strided_slice %23 {offsets = [0, 1, 0], sizes = [1, 1, 8], strides = [1, 1, 1]} : vector<1x3x8xf32> to vector<1x1x8xf32>
    %26 = vector.extract_strided_slice %23 {offsets = [0, 2, 0], sizes = [1, 1, 8], strides = [1, 1, 1]} : vector<1x3x8xf32> to vector<1x1x8xf32>
    %27 = arith.mulf %24, %24 : vector<1x1x8xf32>
    %cst_13 = arith.constant dense<0.000000e+00> : vector<1x1xf32>
    %28 = vector.multi_reduction <add>, %27, %cst_13 [2] : vector<1x1x8xf32> to vector<1x1xf32>
    %29 = vector.shape_cast %28 : vector<1x1xf32> to vector<1x1x1xf32>
    %cst_14 = arith.constant 1.000000e-30 : f32
    %30 = vector.broadcast %cst_14 : f32 to vector<1x1x1xf32>
    %31 = arith.addf %29, %30 : vector<1x1x1xf32>
    %32 = math.rsqrt %31 : vector<1x1x1xf32>
    %33 = vector.broadcast %32 : vector<1x1x1xf32> to vector<1x1x8xf32>
    %34 = arith.mulf %24, %33 : vector<1x1x8xf32>
    %35 = arith.mulf %34, %25 : vector<1x1x8xf32>
    %cst_15 = arith.constant dense<0.000000e+00> : vector<1x1xf32>
    %36 = vector.multi_reduction <add>, %35, %cst_15 [2] : vector<1x1x8xf32> to vector<1x1xf32>
    %37 = vector.shape_cast %36 : vector<1x1xf32> to vector<1x1x1xf32>
    %38 = vector.broadcast %37 : vector<1x1x1xf32> to vector<1x1x8xf32>
    %39 = arith.mulf %38, %34 : vector<1x1x8xf32>
    %40 = arith.subf %25, %39 : vector<1x1x8xf32>
    %41 = arith.mulf %40, %40 : vector<1x1x8xf32>
    %cst_16 = arith.constant dense<0.000000e+00> : vector<1x1xf32>
    %42 = vector.multi_reduction <add>, %41, %cst_16 [2] : vector<1x1x8xf32> to vector<1x1xf32>
    %43 = vector.shape_cast %42 : vector<1x1xf32> to vector<1x1x1xf32>
    %cst_17 = arith.constant 1.000000e-30 : f32
    %44 = vector.broadcast %cst_17 : f32 to vector<1x1x1xf32>
    %45 = arith.addf %43, %44 : vector<1x1x1xf32>
    %46 = math.rsqrt %45 : vector<1x1x1xf32>
    %47 = vector.broadcast %46 : vector<1x1x1xf32> to vector<1x1x8xf32>
    %48 = arith.mulf %40, %47 : vector<1x1x8xf32>
    %49 = arith.mulf %34, %26 : vector<1x1x8xf32>
    %cst_18 = arith.constant dense<0.000000e+00> : vector<1x1xf32>
    %50 = vector.multi_reduction <add>, %49, %cst_18 [2] : vector<1x1x8xf32> to vector<1x1xf32>
    %51 = vector.shape_cast %50 : vector<1x1xf32> to vector<1x1x1xf32>
    %52 = vector.broadcast %51 : vector<1x1x1xf32> to vector<1x1x8xf32>
    %53 = arith.mulf %52, %34 : vector<1x1x8xf32>
    %54 = arith.subf %26, %53 : vector<1x1x8xf32>
    %55 = arith.mulf %48, %54 : vector<1x1x8xf32>
    %cst_19 = arith.constant dense<0.000000e+00> : vector<1x1xf32>
    %56 = vector.multi_reduction <add>, %55, %cst_19 [2] : vector<1x1x8xf32> to vector<1x1xf32>
    %57 = vector.shape_cast %56 : vector<1x1xf32> to vector<1x1x1xf32>
    %58 = vector.broadcast %57 : vector<1x1x1xf32> to vector<1x1x8xf32>
    %59 = arith.mulf %58, %48 : vector<1x1x8xf32>
    %60 = arith.subf %54, %59 : vector<1x1x8xf32>
    %61 = arith.mulf %60, %60 : vector<1x1x8xf32>
    %cst_20 = arith.constant dense<0.000000e+00> : vector<1x1xf32>
    %62 = vector.multi_reduction <add>, %61, %cst_20 [2] : vector<1x1x8xf32> to vector<1x1xf32>
    %63 = vector.shape_cast %62 : vector<1x1xf32> to vector<1x1x1xf32>
    %cst_21 = arith.constant 1.000000e-30 : f32
    %64 = vector.broadcast %cst_21 : f32 to vector<1x1x1xf32>
    %65 = arith.addf %63, %64 : vector<1x1x1xf32>
    %66 = math.rsqrt %65 : vector<1x1x1xf32>
    %67 = vector.broadcast %66 : vector<1x1x1xf32> to vector<1x1x8xf32>
    %68 = arith.mulf %60, %67 : vector<1x1x8xf32>
    %69 = tpu.concatenate %34, %48, %68 in 1 : vector<1x1x8xf32>, vector<1x1x8xf32>, vector<1x1x8xf32> -> vector<1x3x8xf32>
    %c1_i32 = arith.constant 1 : i32
    "tpu.trace_start"() <{level = 10 : i32, message = "bmc,bcd->bmd"}> : () -> ()
    %cst_22 = arith.constant dense<0.000000e+00> : vector<1x3x8xf32>
    %70 = tpu.matmul %69, %18, %cst_22 {dimension_numbers = #tpu.dot_dimension_numbers<[2], [1], [1], [2], [0, 0, 0, 1, 1, 2], [0], [0]>} : vector<1x3x8xf32>, vector<1x8x8xf32>, vector<1x3x8xf32> -> vector<1x3x8xf32>
    %cst_23 = arith.constant dense<0.000000e+00> : vector<1x3x8xf32>
    %71 = tpu.matmul %70, %18, %cst_23 {dimension_numbers = #tpu.dot_dimension_numbers<[2], [1], [1], [2], [0, 0, 0, 1, 1, 2], [0], [0]>} : vector<1x3x8xf32>, vector<1x8x8xf32>, vector<1x3x8xf32> -> vector<1x3x8xf32>
    "tpu.trace_stop"() : () -> ()
    %72 = vector.extract_strided_slice %71 {offsets = [0, 0, 0], sizes = [1, 1, 8], strides = [1, 1, 1]} : vector<1x3x8xf32> to vector<1x1x8xf32>
    %73 = vector.extract_strided_slice %71 {offsets = [0, 1, 0], sizes = [1, 1, 8], strides = [1, 1, 1]} : vector<1x3x8xf32> to vector<1x1x8xf32>
    %74 = vector.extract_strided_slice %71 {offsets = [0, 2, 0], sizes = [1, 1, 8], strides = [1, 1, 1]} : vector<1x3x8xf32> to vector<1x1x8xf32>
    %75 = arith.mulf %72, %72 : vector<1x1x8xf32>
    %cst_24 = arith.constant dense<0.000000e+00> : vector<1x1xf32>
    %76 = vector.multi_reduction <add>, %75, %cst_24 [2] : vector<1x1x8xf32> to vector<1x1xf32>
    %77 = vector.shape_cast %76 : vector<1x1xf32> to vector<1x1x1xf32>
    %cst_25 = arith.constant 1.000000e-30 : f32
    %78 = vector.broadcast %cst_25 : f32 to vector<1x1x1xf32>
    %79 = arith.addf %77, %78 : vector<1x1x1xf32>
    %80 = math.rsqrt %79 : vector<1x1x1xf32>
    %81 = vector.broadcast %80 : vector<1x1x1xf32> to vector<1x1x8xf32>
    %82 = arith.mulf %72, %81 : vector<1x1x8xf32>
    %83 = arith.mulf %82, %73 : vector<1x1x8xf32>
    %cst_26 = arith.constant dense<0.000000e+00> : vector<1x1xf32>
    %84 = vector.multi_reduction <add>, %83, %cst_26 [2] : vector<1x1x8xf32> to vector<1x1xf32>
    %85 = vector.shape_cast %84 : vector<1x1xf32> to vector<1x1x1xf32>
    %86 = vector.broadcast %85 : vector<1x1x1xf32> to vector<1x1x8xf32>
    %87 = arith.mulf %86, %82 : vector<1x1x8xf32>
    %88 = arith.subf %73, %87 : vector<1x1x8xf32>
    %89 = arith.mulf %88, %88 : vector<1x1x8xf32>
    %cst_27 = arith.constant dense<0.000000e+00> : vector<1x1xf32>
    %90 = vector.multi_reduction <add>, %89, %cst_27 [2] : vector<1x1x8xf32> to vector<1x1xf32>
    %91 = vector.shape_cast %90 : vector<1x1xf32> to vector<1x1x1xf32>
    %cst_28 = arith.constant 1.000000e-30 : f32
    %92 = vector.broadcast %cst_28 : f32 to vector<1x1x1xf32>
    %93 = arith.addf %91, %92 : vector<1x1x1xf32>
    %94 = math.rsqrt %93 : vector<1x1x1xf32>
    %95 = vector.broadcast %94 : vector<1x1x1xf32> to vector<1x1x8xf32>
    %96 = arith.mulf %88, %95 : vector<1x1x8xf32>
    %97 = arith.mulf %82, %74 : vector<1x1x8xf32>
    %cst_29 = arith.constant dense<0.000000e+00> : vector<1x1xf32>
    %98 = vector.multi_reduction <add>, %97, %cst_29 [2] : vector<1x1x8xf32> to vector<1x1xf32>
    %99 = vector.shape_cast %98 : vector<1x1xf32> to vector<1x1x1xf32>
    %100 = vector.broadcast %99 : vector<1x1x1xf32> to vector<1x1x8xf32>
    %101 = arith.mulf %100, %82 : vector<1x1x8xf32>
    %102 = arith.subf %74, %101 : vector<1x1x8xf32>
    %103 = arith.mulf %96, %102 : vector<1x1x8xf32>
    %cst_30 = arith.constant dense<0.000000e+00> : vector<1x1xf32>
    %104 = vector.multi_reduction <add>, %103, %cst_30 [2] : vector<1x1x8xf32> to vector<1x1xf32>
    %105 = vector.shape_cast %104 : vector<1x1xf32> to vector<1x1x1xf32>
    %106 = vector.broadcast %105 : vector<1x1x1xf32> to vector<1x1x8xf32>
    %107 = arith.mulf %106, %96 : vector<1x1x8xf32>
    %108 = arith.subf %102, %107 : vector<1x1x8xf32>
    %109 = arith.mulf %108, %108 : vector<1x1x8xf32>
    %cst_31 = arith.constant dense<0.000000e+00> : vector<1x1xf32>
    %110 = vector.multi_reduction <add>, %109, %cst_31 [2] : vector<1x1x8xf32> to vector<1x1xf32>
    %111 = vector.shape_cast %110 : vector<1x1xf32> to vector<1x1x1xf32>
    %cst_32 = arith.constant 1.000000e-30 : f32
    %112 = vector.broadcast %cst_32 : f32 to vector<1x1x1xf32>
    %113 = arith.addf %111, %112 : vector<1x1x1xf32>
    %114 = math.rsqrt %113 : vector<1x1x1xf32>
    %115 = vector.broadcast %114 : vector<1x1x1xf32> to vector<1x1x8xf32>
    %116 = arith.mulf %108, %115 : vector<1x1x8xf32>
    %117 = tpu.concatenate %82, %96, %116 in 1 : vector<1x1x8xf32>, vector<1x1x8xf32>, vector<1x1x8xf32> -> vector<1x3x8xf32>
    %c2_i32 = arith.constant 2 : i32
    "tpu.trace_start"() <{level = 10 : i32, message = "bmc,bcd->bmd"}> : () -> ()
    %cst_33 = arith.constant dense<0.000000e+00> : vector<1x3x8xf32>
    %118 = tpu.matmul %117, %18, %cst_33 {dimension_numbers = #tpu.dot_dimension_numbers<[2], [1], [1], [2], [0, 0, 0, 1, 1, 2], [0], [0]>} : vector<1x3x8xf32>, vector<1x8x8xf32>, vector<1x3x8xf32> -> vector<1x3x8xf32>
    %cst_34 = arith.constant dense<0.000000e+00> : vector<1x3x8xf32>
    %119 = tpu.matmul %118, %18, %cst_34 {dimension_numbers = #tpu.dot_dimension_numbers<[2], [1], [1], [2], [0, 0, 0, 1, 1, 2], [0], [0]>} : vector<1x3x8xf32>, vector<1x8x8xf32>, vector<1x3x8xf32> -> vector<1x3x8xf32>
    "tpu.trace_stop"() : () -> ()
    %120 = vector.extract_strided_slice %119 {offsets = [0, 0, 0], sizes = [1, 1, 8], strides = [1, 1, 1]} : vector<1x3x8xf32> to vector<1x1x8xf32>
    %121 = vector.extract_strided_slice %119 {offsets = [0, 1, 0], sizes = [1, 1, 8], strides = [1, 1, 1]} : vector<1x3x8xf32> to vector<1x1x8xf32>
    %122 = vector.extract_strided_slice %119 {offsets = [0, 2, 0], sizes = [1, 1, 8], strides = [1, 1, 1]} : vector<1x3x8xf32> to vector<1x1x8xf32>
    %123 = arith.mulf %120, %120 : vector<1x1x8xf32>
    %cst_35 = arith.constant dense<0.000000e+00> : vector<1x1xf32>
    %124 = vector.multi_reduction <add>, %123, %cst_35 [2] : vector<1x1x8xf32> to vector<1x1xf32>
    %125 = vector.shape_cast %124 : vector<1x1xf32> to vector<1x1x1xf32>
    %cst_36 = arith.constant 1.000000e-30 : f32
    %126 = vector.broadcast %cst_36 : f32 to vector<1x1x1xf32>
    %127 = arith.addf %125, %126 : vector<1x1x1xf32>
    %128 = math.rsqrt %127 : vector<1x1x1xf32>
    %129 = vector.broadcast %128 : vector<1x1x1xf32> to vector<1x1x8xf32>
    %130 = arith.mulf %120, %129 : vector<1x1x8xf32>
    %131 = arith.mulf %130, %121 : vector<1x1x8xf32>
    %cst_37 = arith.constant dense<0.000000e+00> : vector<1x1xf32>
    %132 = vector.multi_reduction <add>, %131, %cst_37 [2] : vector<1x1x8xf32> to vector<1x1xf32>
    %133 = vector.shape_cast %132 : vector<1x1xf32> to vector<1x1x1xf32>
    %134 = vector.broadcast %133 : vector<1x1x1xf32> to vector<1x1x8xf32>
    %135 = arith.mulf %134, %130 : vector<1x1x8xf32>
    %136 = arith.subf %121, %135 : vector<1x1x8xf32>
    %137 = arith.mulf %136, %136 : vector<1x1x8xf32>
    %cst_38 = arith.constant dense<0.000000e+00> : vector<1x1xf32>
    %138 = vector.multi_reduction <add>, %137, %cst_38 [2] : vector<1x1x8xf32> to vector<1x1xf32>
    %139 = vector.shape_cast %138 : vector<1x1xf32> to vector<1x1x1xf32>
    %cst_39 = arith.constant 1.000000e-30 : f32
    %140 = vector.broadcast %cst_39 : f32 to vector<1x1x1xf32>
    %141 = arith.addf %139, %140 : vector<1x1x1xf32>
    %142 = math.rsqrt %141 : vector<1x1x1xf32>
    %143 = vector.broadcast %142 : vector<1x1x1xf32> to vector<1x1x8xf32>
    %144 = arith.mulf %136, %143 : vector<1x1x8xf32>
    %145 = arith.mulf %130, %122 : vector<1x1x8xf32>
    %cst_40 = arith.constant dense<0.000000e+00> : vector<1x1xf32>
    %146 = vector.multi_reduction <add>, %145, %cst_40 [2] : vector<1x1x8xf32> to vector<1x1xf32>
    %147 = vector.shape_cast %146 : vector<1x1xf32> to vector<1x1x1xf32>
    %148 = vector.broadcast %147 : vector<1x1x1xf32> to vector<1x1x8xf32>
    %149 = arith.mulf %148, %130 : vector<1x1x8xf32>
    %150 = arith.subf %122, %149 : vector<1x1x8xf32>
    %151 = arith.mulf %144, %150 : vector<1x1x8xf32>
    %cst_41 = arith.constant dense<0.000000e+00> : vector<1x1xf32>
    %152 = vector.multi_reduction <add>, %151, %cst_41 [2] : vector<1x1x8xf32> to vector<1x1xf32>
    %153 = vector.shape_cast %152 : vector<1x1xf32> to vector<1x1x1xf32>
    %154 = vector.broadcast %153 : vector<1x1x1xf32> to vector<1x1x8xf32>
    %155 = arith.mulf %154, %144 : vector<1x1x8xf32>
    %156 = arith.subf %150, %155 : vector<1x1x8xf32>
    %157 = arith.mulf %156, %156 : vector<1x1x8xf32>
    %cst_42 = arith.constant dense<0.000000e+00> : vector<1x1xf32>
    %158 = vector.multi_reduction <add>, %157, %cst_42 [2] : vector<1x1x8xf32> to vector<1x1xf32>
    %159 = vector.shape_cast %158 : vector<1x1xf32> to vector<1x1x1xf32>
    %cst_43 = arith.constant 1.000000e-30 : f32
    %160 = vector.broadcast %cst_43 : f32 to vector<1x1x1xf32>
    %161 = arith.addf %159, %160 : vector<1x1x1xf32>
    %162 = math.rsqrt %161 : vector<1x1x1xf32>
    %163 = vector.broadcast %162 : vector<1x1x1xf32> to vector<1x1x8xf32>
    %164 = arith.mulf %156, %163 : vector<1x1x8xf32>
    %165 = tpu.concatenate %130, %144, %164 in 1 : vector<1x1x8xf32>, vector<1x1x8xf32>, vector<1x1x8xf32> -> vector<1x3x8xf32>
    %c3_i32 = arith.constant 3 : i32
    "tpu.trace_start"() <{level = 10 : i32, message = "bmc,bcd->bmd"}> : () -> ()
    %cst_44 = arith.constant dense<0.000000e+00> : vector<1x3x8xf32>
    %166 = tpu.matmul %165, %18, %cst_44 {dimension_numbers = #tpu.dot_dimension_numbers<[2], [1], [1], [2], [0, 0, 0, 1, 1, 2], [0], [0]>} : vector<1x3x8xf32>, vector<1x8x8xf32>, vector<1x3x8xf32> -> vector<1x3x8xf32>
    %cst_45 = arith.constant dense<0.000000e+00> : vector<1x3x8xf32>
    %167 = tpu.matmul %166, %18, %cst_45 {dimension_numbers = #tpu.dot_dimension_numbers<[2], [1], [1], [2], [0, 0, 0, 1, 1, 2], [0], [0]>} : vector<1x3x8xf32>, vector<1x8x8xf32>, vector<1x3x8xf32> -> vector<1x3x8xf32>
    "tpu.trace_stop"() : () -> ()
    %168 = vector.extract_strided_slice %167 {offsets = [0, 0, 0], sizes = [1, 1, 8], strides = [1, 1, 1]} : vector<1x3x8xf32> to vector<1x1x8xf32>
    %169 = vector.extract_strided_slice %167 {offsets = [0, 1, 0], sizes = [1, 1, 8], strides = [1, 1, 1]} : vector<1x3x8xf32> to vector<1x1x8xf32>
    %170 = vector.extract_strided_slice %167 {offsets = [0, 2, 0], sizes = [1, 1, 8], strides = [1, 1, 1]} : vector<1x3x8xf32> to vector<1x1x8xf32>
    %171 = arith.mulf %168, %168 : vector<1x1x8xf32>
    %cst_46 = arith.constant dense<0.000000e+00> : vector<1x1xf32>
    %172 = vector.multi_reduction <add>, %171, %cst_46 [2] : vector<1x1x8xf32> to vector<1x1xf32>
    %173 = vector.shape_cast %172 : vector<1x1xf32> to vector<1x1x1xf32>
    %cst_47 = arith.constant 1.000000e-30 : f32
    %174 = vector.broadcast %cst_47 : f32 to vector<1x1x1xf32>
    %175 = arith.addf %173, %174 : vector<1x1x1xf32>
    %176 = math.rsqrt %175 : vector<1x1x1xf32>
    %177 = vector.broadcast %176 : vector<1x1x1xf32> to vector<1x1x8xf32>
    %178 = arith.mulf %168, %177 : vector<1x1x8xf32>
    %179 = arith.mulf %178, %169 : vector<1x1x8xf32>
    %cst_48 = arith.constant dense<0.000000e+00> : vector<1x1xf32>
    %180 = vector.multi_reduction <add>, %179, %cst_48 [2] : vector<1x1x8xf32> to vector<1x1xf32>
    %181 = vector.shape_cast %180 : vector<1x1xf32> to vector<1x1x1xf32>
    %182 = vector.broadcast %181 : vector<1x1x1xf32> to vector<1x1x8xf32>
    %183 = arith.mulf %182, %178 : vector<1x1x8xf32>
    %184 = arith.subf %169, %183 : vector<1x1x8xf32>
    %185 = arith.mulf %184, %184 : vector<1x1x8xf32>
    %cst_49 = arith.constant dense<0.000000e+00> : vector<1x1xf32>
    %186 = vector.multi_reduction <add>, %185, %cst_49 [2] : vector<1x1x8xf32> to vector<1x1xf32>
    %187 = vector.shape_cast %186 : vector<1x1xf32> to vector<1x1x1xf32>
    %cst_50 = arith.constant 1.000000e-30 : f32
    %188 = vector.broadcast %cst_50 : f32 to vector<1x1x1xf32>
    %189 = arith.addf %187, %188 : vector<1x1x1xf32>
    %190 = math.rsqrt %189 : vector<1x1x1xf32>
    %191 = vector.broadcast %190 : vector<1x1x1xf32> to vector<1x1x8xf32>
    %192 = arith.mulf %184, %191 : vector<1x1x8xf32>
    %193 = arith.mulf %178, %170 : vector<1x1x8xf32>
    %cst_51 = arith.constant dense<0.000000e+00> : vector<1x1xf32>
    %194 = vector.multi_reduction <add>, %193, %cst_51 [2] : vector<1x1x8xf32> to vector<1x1xf32>
    %195 = vector.shape_cast %194 : vector<1x1xf32> to vector<1x1x1xf32>
    %196 = vector.broadcast %195 : vector<1x1x1xf32> to vector<1x1x8xf32>
    %197 = arith.mulf %196, %178 : vector<1x1x8xf32>
    %198 = arith.subf %170, %197 : vector<1x1x8xf32>
    %199 = arith.mulf %192, %198 : vector<1x1x8xf32>
    %cst_52 = arith.constant dense<0.000000e+00> : vector<1x1xf32>
    %200 = vector.multi_reduction <add>, %199, %cst_52 [2] : vector<1x1x8xf32> to vector<1x1xf32>
    %201 = vector.shape_cast %200 : vector<1x1xf32> to vector<1x1x1xf32>
    %202 = vector.broadcast %201 : vector<1x1x1xf32> to vector<1x1x8xf32>
    %203 = arith.mulf %202, %192 : vector<1x1x8xf32>
    %204 = arith.subf %198, %203 : vector<1x1x8xf32>
    %205 = arith.mulf %204, %204 : vector<1x1x8xf32>
    %cst_53 = arith.constant dense<0.000000e+00> : vector<1x1xf32>
    %206 = vector.multi_reduction <add>, %205, %cst_53 [2] : vector<1x1x8xf32> to vector<1x1xf32>
    %207 = vector.shape_cast %206 : vector<1x1xf32> to vector<1x1x1xf32>
    %cst_54 = arith.constant 1.000000e-30 : f32
    %208 = vector.broadcast %cst_54 : f32 to vector<1x1x1xf32>
    %209 = arith.addf %207, %208 : vector<1x1x1xf32>
    %210 = math.rsqrt %209 : vector<1x1x1xf32>
    %211 = vector.broadcast %210 : vector<1x1x1xf32> to vector<1x1x8xf32>
    %212 = arith.mulf %204, %211 : vector<1x1x8xf32>
    %213 = tpu.concatenate %178, %192, %212 in 1 : vector<1x1x8xf32>, vector<1x1x8xf32>, vector<1x1x8xf32> -> vector<1x3x8xf32>
    %c4_i32 = arith.constant 4 : i32
    "tpu.trace_start"() <{level = 10 : i32, message = "bmc,bcd->bmd"}> : () -> ()
    %cst_55 = arith.constant dense<0.000000e+00> : vector<1x3x8xf32>
    %214 = tpu.matmul %213, %18, %cst_55 {dimension_numbers = #tpu.dot_dimension_numbers<[2], [1], [1], [2], [0, 0, 0, 1, 1, 2], [0], [0]>} : vector<1x3x8xf32>, vector<1x8x8xf32>, vector<1x3x8xf32> -> vector<1x3x8xf32>
    %cst_56 = arith.constant dense<0.000000e+00> : vector<1x3x8xf32>
    %215 = tpu.matmul %214, %18, %cst_56 {dimension_numbers = #tpu.dot_dimension_numbers<[2], [1], [1], [2], [0, 0, 0, 1, 1, 2], [0], [0]>} : vector<1x3x8xf32>, vector<1x8x8xf32>, vector<1x3x8xf32> -> vector<1x3x8xf32>
    "tpu.trace_stop"() : () -> ()
    %216 = vector.extract_strided_slice %215 {offsets = [0, 0, 0], sizes = [1, 1, 8], strides = [1, 1, 1]} : vector<1x3x8xf32> to vector<1x1x8xf32>
    %217 = vector.extract_strided_slice %215 {offsets = [0, 1, 0], sizes = [1, 1, 8], strides = [1, 1, 1]} : vector<1x3x8xf32> to vector<1x1x8xf32>
    %218 = vector.extract_strided_slice %215 {offsets = [0, 2, 0], sizes = [1, 1, 8], strides = [1, 1, 1]} : vector<1x3x8xf32> to vector<1x1x8xf32>
    %219 = arith.mulf %216, %216 : vector<1x1x8xf32>
    %cst_57 = arith.constant dense<0.000000e+00> : vector<1x1xf32>
    %220 = vector.multi_reduction <add>, %219, %cst_57 [2] : vector<1x1x8xf32> to vector<1x1xf32>
    %221 = vector.shape_cast %220 : vector<1x1xf32> to vector<1x1x1xf32>
    %cst_58 = arith.constant 1.000000e-30 : f32
    %222 = vector.broadcast %cst_58 : f32 to vector<1x1x1xf32>
    %223 = arith.addf %221, %222 : vector<1x1x1xf32>
    %224 = math.rsqrt %223 : vector<1x1x1xf32>
    %225 = vector.broadcast %224 : vector<1x1x1xf32> to vector<1x1x8xf32>
    %226 = arith.mulf %216, %225 : vector<1x1x8xf32>
    %227 = arith.mulf %226, %217 : vector<1x1x8xf32>
    %cst_59 = arith.constant dense<0.000000e+00> : vector<1x1xf32>
    %228 = vector.multi_reduction <add>, %227, %cst_59 [2] : vector<1x1x8xf32> to vector<1x1xf32>
    %229 = vector.shape_cast %228 : vector<1x1xf32> to vector<1x1x1xf32>
    %230 = vector.broadcast %229 : vector<1x1x1xf32> to vector<1x1x8xf32>
    %231 = arith.mulf %230, %226 : vector<1x1x8xf32>
    %232 = arith.subf %217, %231 : vector<1x1x8xf32>
    %233 = arith.mulf %232, %232 : vector<1x1x8xf32>
    %cst_60 = arith.constant dense<0.000000e+00> : vector<1x1xf32>
    %234 = vector.multi_reduction <add>, %233, %cst_60 [2] : vector<1x1x8xf32> to vector<1x1xf32>
    %235 = vector.shape_cast %234 : vector<1x1xf32> to vector<1x1x1xf32>
    %cst_61 = arith.constant 1.000000e-30 : f32
    %236 = vector.broadcast %cst_61 : f32 to vector<1x1x1xf32>
    %237 = arith.addf %235, %236 : vector<1x1x1xf32>
    %238 = math.rsqrt %237 : vector<1x1x1xf32>
    %239 = vector.broadcast %238 : vector<1x1x1xf32> to vector<1x1x8xf32>
    %240 = arith.mulf %232, %239 : vector<1x1x8xf32>
    %241 = arith.mulf %226, %218 : vector<1x1x8xf32>
    %cst_62 = arith.constant dense<0.000000e+00> : vector<1x1xf32>
    %242 = vector.multi_reduction <add>, %241, %cst_62 [2] : vector<1x1x8xf32> to vector<1x1xf32>
    %243 = vector.shape_cast %242 : vector<1x1xf32> to vector<1x1x1xf32>
    %244 = vector.broadcast %243 : vector<1x1x1xf32> to vector<1x1x8xf32>
    %245 = arith.mulf %244, %226 : vector<1x1x8xf32>
    %246 = arith.subf %218, %245 : vector<1x1x8xf32>
    %247 = arith.mulf %240, %246 : vector<1x1x8xf32>
    %cst_63 = arith.constant dense<0.000000e+00> : vector<1x1xf32>
    %248 = vector.multi_reduction <add>, %247, %cst_63 [2] : vector<1x1x8xf32> to vector<1x1xf32>
    %249 = vector.shape_cast %248 : vector<1x1xf32> to vector<1x1x1xf32>
    %250 = vector.broadcast %249 : vector<1x1x1xf32> to vector<1x1x8xf32>
    %251 = arith.mulf %250, %240 : vector<1x1x8xf32>
    %252 = arith.subf %246, %251 : vector<1x1x8xf32>
    %253 = arith.mulf %252, %252 : vector<1x1x8xf32>
    %cst_64 = arith.constant dense<0.000000e+00> : vector<1x1xf32>
    %254 = vector.multi_reduction <add>, %253, %cst_64 [2] : vector<1x1x8xf32> to vector<1x1xf32>
    %255 = vector.shape_cast %254 : vector<1x1xf32> to vector<1x1x1xf32>
    %cst_65 = arith.constant 1.000000e-30 : f32
    %256 = vector.broadcast %cst_65 : f32 to vector<1x1x1xf32>
    %257 = arith.addf %255, %256 : vector<1x1x1xf32>
    %258 = math.rsqrt %257 : vector<1x1x1xf32>
    %259 = vector.broadcast %258 : vector<1x1x1xf32> to vector<1x1x8xf32>
    %260 = arith.mulf %252, %259 : vector<1x1x8xf32>
    %261 = tpu.concatenate %226, %240, %260 in 1 : vector<1x1x8xf32>, vector<1x1x8xf32>, vector<1x1x8xf32> -> vector<1x3x8xf32>
    %c5_i32 = arith.constant 5 : i32
    "tpu.trace_start"() <{level = 10 : i32, message = "bmc,bcd->bmd"}> : () -> ()
    %cst_66 = arith.constant dense<0.000000e+00> : vector<1x3x8xf32>
    %262 = tpu.matmul %261, %18, %cst_66 {dimension_numbers = #tpu.dot_dimension_numbers<[2], [1], [1], [2], [0, 0, 0, 1, 1, 2], [0], [0]>} : vector<1x3x8xf32>, vector<1x8x8xf32>, vector<1x3x8xf32> -> vector<1x3x8xf32>
    %cst_67 = arith.constant dense<0.000000e+00> : vector<1x3x8xf32>
    %263 = tpu.matmul %262, %18, %cst_67 {dimension_numbers = #tpu.dot_dimension_numbers<[2], [1], [1], [2], [0, 0, 0, 1, 1, 2], [0], [0]>} : vector<1x3x8xf32>, vector<1x8x8xf32>, vector<1x3x8xf32> -> vector<1x3x8xf32>
    "tpu.trace_stop"() : () -> ()
    %264 = vector.extract_strided_slice %263 {offsets = [0, 0, 0], sizes = [1, 1, 8], strides = [1, 1, 1]} : vector<1x3x8xf32> to vector<1x1x8xf32>
    %265 = vector.extract_strided_slice %263 {offsets = [0, 1, 0], sizes = [1, 1, 8], strides = [1, 1, 1]} : vector<1x3x8xf32> to vector<1x1x8xf32>
    %266 = vector.extract_strided_slice %263 {offsets = [0, 2, 0], sizes = [1, 1, 8], strides = [1, 1, 1]} : vector<1x3x8xf32> to vector<1x1x8xf32>
    %267 = arith.mulf %264, %264 : vector<1x1x8xf32>
    %cst_68 = arith.constant dense<0.000000e+00> : vector<1x1xf32>
    %268 = vector.multi_reduction <add>, %267, %cst_68 [2] : vector<1x1x8xf32> to vector<1x1xf32>
    %269 = vector.shape_cast %268 : vector<1x1xf32> to vector<1x1x1xf32>
    %cst_69 = arith.constant 1.000000e-30 : f32
    %270 = vector.broadcast %cst_69 : f32 to vector<1x1x1xf32>
    %271 = arith.addf %269, %270 : vector<1x1x1xf32>
    %272 = math.rsqrt %271 : vector<1x1x1xf32>
    %273 = vector.broadcast %272 : vector<1x1x1xf32> to vector<1x1x8xf32>
    %274 = arith.mulf %264, %273 : vector<1x1x8xf32>
    %275 = arith.mulf %274, %265 : vector<1x1x8xf32>
    %cst_70 = arith.constant dense<0.000000e+00> : vector<1x1xf32>
    %276 = vector.multi_reduction <add>, %275, %cst_70 [2] : vector<1x1x8xf32> to vector<1x1xf32>
    %277 = vector.shape_cast %276 : vector<1x1xf32> to vector<1x1x1xf32>
    %278 = vector.broadcast %277 : vector<1x1x1xf32> to vector<1x1x8xf32>
    %279 = arith.mulf %278, %274 : vector<1x1x8xf32>
    %280 = arith.subf %265, %279 : vector<1x1x8xf32>
    %281 = arith.mulf %280, %280 : vector<1x1x8xf32>
    %cst_71 = arith.constant dense<0.000000e+00> : vector<1x1xf32>
    %282 = vector.multi_reduction <add>, %281, %cst_71 [2] : vector<1x1x8xf32> to vector<1x1xf32>
    %283 = vector.shape_cast %282 : vector<1x1xf32> to vector<1x1x1xf32>
    %cst_72 = arith.constant 1.000000e-30 : f32
    %284 = vector.broadcast %cst_72 : f32 to vector<1x1x1xf32>
    %285 = arith.addf %283, %284 : vector<1x1x1xf32>
    %286 = math.rsqrt %285 : vector<1x1x1xf32>
    %287 = vector.broadcast %286 : vector<1x1x1xf32> to vector<1x1x8xf32>
    %288 = arith.mulf %280, %287 : vector<1x1x8xf32>
    %289 = arith.mulf %274, %266 : vector<1x1x8xf32>
    %cst_73 = arith.constant dense<0.000000e+00> : vector<1x1xf32>
    %290 = vector.multi_reduction <add>, %289, %cst_73 [2] : vector<1x1x8xf32> to vector<1x1xf32>
    %291 = vector.shape_cast %290 : vector<1x1xf32> to vector<1x1x1xf32>
    %292 = vector.broadcast %291 : vector<1x1x1xf32> to vector<1x1x8xf32>
    %293 = arith.mulf %292, %274 : vector<1x1x8xf32>
    %294 = arith.subf %266, %293 : vector<1x1x8xf32>
    %295 = arith.mulf %288, %294 : vector<1x1x8xf32>
    %cst_74 = arith.constant dense<0.000000e+00> : vector<1x1xf32>
    %296 = vector.multi_reduction <add>, %295, %cst_74 [2] : vector<1x1x8xf32> to vector<1x1xf32>
    %297 = vector.shape_cast %296 : vector<1x1xf32> to vector<1x1x1xf32>
    %298 = vector.broadcast %297 : vector<1x1x1xf32> to vector<1x1x8xf32>
    %299 = arith.mulf %298, %288 : vector<1x1x8xf32>
    %300 = arith.subf %294, %299 : vector<1x1x8xf32>
    %301 = arith.mulf %300, %300 : vector<1x1x8xf32>
    %cst_75 = arith.constant dense<0.000000e+00> : vector<1x1xf32>
    %302 = vector.multi_reduction <add>, %301, %cst_75 [2] : vector<1x1x8xf32> to vector<1x1xf32>
    %303 = vector.shape_cast %302 : vector<1x1xf32> to vector<1x1x1xf32>
    %cst_76 = arith.constant 1.000000e-30 : f32
    %304 = vector.broadcast %cst_76 : f32 to vector<1x1x1xf32>
    %305 = arith.addf %303, %304 : vector<1x1x1xf32>
    %306 = math.rsqrt %305 : vector<1x1x1xf32>
    %307 = vector.broadcast %306 : vector<1x1x1xf32> to vector<1x1x8xf32>
    %308 = arith.mulf %300, %307 : vector<1x1x8xf32>
    %309 = tpu.concatenate %274, %288, %308 in 1 : vector<1x1x8xf32>, vector<1x1x8xf32>, vector<1x1x8xf32> -> vector<1x3x8xf32>
    %c6_i32 = arith.constant 6 : i32
    "tpu.trace_start"() <{level = 10 : i32, message = "bmc,bcd->bmd"}> : () -> ()
    %cst_77 = arith.constant dense<0.000000e+00> : vector<1x3x8xf32>
    %310 = tpu.matmul %309, %18, %cst_77 {dimension_numbers = #tpu.dot_dimension_numbers<[2], [1], [1], [2], [0, 0, 0, 1, 1, 2], [0], [0]>} : vector<1x3x8xf32>, vector<1x8x8xf32>, vector<1x3x8xf32> -> vector<1x3x8xf32>
    %cst_78 = arith.constant dense<0.000000e+00> : vector<1x3x8xf32>
    %311 = tpu.matmul %310, %18, %cst_78 {dimension_numbers = #tpu.dot_dimension_numbers<[2], [1], [1], [2], [0, 0, 0, 1, 1, 2], [0], [0]>} : vector<1x3x8xf32>, vector<1x8x8xf32>, vector<1x3x8xf32> -> vector<1x3x8xf32>
    "tpu.trace_stop"() : () -> ()
    %312 = vector.extract_strided_slice %311 {offsets = [0, 0, 0], sizes = [1, 1, 8], strides = [1, 1, 1]} : vector<1x3x8xf32> to vector<1x1x8xf32>
    %313 = vector.extract_strided_slice %311 {offsets = [0, 1, 0], sizes = [1, 1, 8], strides = [1, 1, 1]} : vector<1x3x8xf32> to vector<1x1x8xf32>
    %314 = vector.extract_strided_slice %311 {offsets = [0, 2, 0], sizes = [1, 1, 8], strides = [1, 1, 1]} : vector<1x3x8xf32> to vector<1x1x8xf32>
    %315 = arith.mulf %312, %312 : vector<1x1x8xf32>
    %cst_79 = arith.constant dense<0.000000e+00> : vector<1x1xf32>
    %316 = vector.multi_reduction <add>, %315, %cst_79 [2] : vector<1x1x8xf32> to vector<1x1xf32>
    %317 = vector.shape_cast %316 : vector<1x1xf32> to vector<1x1x1xf32>
    %cst_80 = arith.constant 1.000000e-30 : f32
    %318 = vector.broadcast %cst_80 : f32 to vector<1x1x1xf32>
    %319 = arith.addf %317, %318 : vector<1x1x1xf32>
    %320 = math.rsqrt %319 : vector<1x1x1xf32>
    %321 = vector.broadcast %320 : vector<1x1x1xf32> to vector<1x1x8xf32>
    %322 = arith.mulf %312, %321 : vector<1x1x8xf32>
    %323 = arith.mulf %322, %313 : vector<1x1x8xf32>
    %cst_81 = arith.constant dense<0.000000e+00> : vector<1x1xf32>
    %324 = vector.multi_reduction <add>, %323, %cst_81 [2] : vector<1x1x8xf32> to vector<1x1xf32>
    %325 = vector.shape_cast %324 : vector<1x1xf32> to vector<1x1x1xf32>
    %326 = vector.broadcast %325 : vector<1x1x1xf32> to vector<1x1x8xf32>
    %327 = arith.mulf %326, %322 : vector<1x1x8xf32>
    %328 = arith.subf %313, %327 : vector<1x1x8xf32>
    %329 = arith.mulf %328, %328 : vector<1x1x8xf32>
    %cst_82 = arith.constant dense<0.000000e+00> : vector<1x1xf32>
    %330 = vector.multi_reduction <add>, %329, %cst_82 [2] : vector<1x1x8xf32> to vector<1x1xf32>
    %331 = vector.shape_cast %330 : vector<1x1xf32> to vector<1x1x1xf32>
    %cst_83 = arith.constant 1.000000e-30 : f32
    %332 = vector.broadcast %cst_83 : f32 to vector<1x1x1xf32>
    %333 = arith.addf %331, %332 : vector<1x1x1xf32>
    %334 = math.rsqrt %333 : vector<1x1x1xf32>
    %335 = vector.broadcast %334 : vector<1x1x1xf32> to vector<1x1x8xf32>
    %336 = arith.mulf %328, %335 : vector<1x1x8xf32>
    %337 = arith.mulf %322, %314 : vector<1x1x8xf32>
    %cst_84 = arith.constant dense<0.000000e+00> : vector<1x1xf32>
    %338 = vector.multi_reduction <add>, %337, %cst_84 [2] : vector<1x1x8xf32> to vector<1x1xf32>
    %339 = vector.shape_cast %338 : vector<1x1xf32> to vector<1x1x1xf32>
    %340 = vector.broadcast %339 : vector<1x1x1xf32> to vector<1x1x8xf32>
    %341 = arith.mulf %340, %322 : vector<1x1x8xf32>
    %342 = arith.subf %314, %341 : vector<1x1x8xf32>
    %343 = arith.mulf %336, %342 : vector<1x1x8xf32>
    %cst_85 = arith.constant dense<0.000000e+00> : vector<1x1xf32>
    %344 = vector.multi_reduction <add>, %343, %cst_85 [2] : vector<1x1x8xf32> to vector<1x1xf32>
    %345 = vector.shape_cast %344 : vector<1x1xf32> to vector<1x1x1xf32>
    %346 = vector.broadcast %345 : vector<1x1x1xf32> to vector<1x1x8xf32>
    %347 = arith.mulf %346, %336 : vector<1x1x8xf32>
    %348 = arith.subf %342, %347 : vector<1x1x8xf32>
    %349 = arith.mulf %348, %348 : vector<1x1x8xf32>
    %cst_86 = arith.constant dense<0.000000e+00> : vector<1x1xf32>
    %350 = vector.multi_reduction <add>, %349, %cst_86 [2] : vector<1x1x8xf32> to vector<1x1xf32>
    %351 = vector.shape_cast %350 : vector<1x1xf32> to vector<1x1x1xf32>
    %cst_87 = arith.constant 1.000000e-30 : f32
    %352 = vector.broadcast %cst_87 : f32 to vector<1x1x1xf32>
    %353 = arith.addf %351, %352 : vector<1x1x1xf32>
    %354 = math.rsqrt %353 : vector<1x1x1xf32>
    %355 = vector.broadcast %354 : vector<1x1x1xf32> to vector<1x1x8xf32>
    %356 = arith.mulf %348, %355 : vector<1x1x8xf32>
    %357 = tpu.concatenate %322, %336, %356 in 1 : vector<1x1x8xf32>, vector<1x1x8xf32>, vector<1x1x8xf32> -> vector<1x3x8xf32>
    %c7_i32 = arith.constant 7 : i32
    "tpu.trace_start"() <{level = 10 : i32, message = "bmc,bcd->bmd"}> : () -> ()
    %cst_88 = arith.constant dense<0.000000e+00> : vector<1x3x8xf32>
    %358 = tpu.matmul %357, %18, %cst_88 {dimension_numbers = #tpu.dot_dimension_numbers<[2], [1], [1], [2], [0, 0, 0, 1, 1, 2], [0], [0]>} : vector<1x3x8xf32>, vector<1x8x8xf32>, vector<1x3x8xf32> -> vector<1x3x8xf32>
    %cst_89 = arith.constant dense<0.000000e+00> : vector<1x3x8xf32>
    %359 = tpu.matmul %358, %18, %cst_89 {dimension_numbers = #tpu.dot_dimension_numbers<[2], [1], [1], [2], [0, 0, 0, 1, 1, 2], [0], [0]>} : vector<1x3x8xf32>, vector<1x8x8xf32>, vector<1x3x8xf32> -> vector<1x3x8xf32>
    "tpu.trace_stop"() : () -> ()
    %360 = vector.extract_strided_slice %359 {offsets = [0, 0, 0], sizes = [1, 1, 8], strides = [1, 1, 1]} : vector<1x3x8xf32> to vector<1x1x8xf32>
    %361 = vector.extract_strided_slice %359 {offsets = [0, 1, 0], sizes = [1, 1, 8], strides = [1, 1, 1]} : vector<1x3x8xf32> to vector<1x1x8xf32>
    %362 = vector.extract_strided_slice %359 {offsets = [0, 2, 0], sizes = [1, 1, 8], strides = [1, 1, 1]} : vector<1x3x8xf32> to vector<1x1x8xf32>
    %363 = arith.mulf %360, %360 : vector<1x1x8xf32>
    %cst_90 = arith.constant dense<0.000000e+00> : vector<1x1xf32>
    %364 = vector.multi_reduction <add>, %363, %cst_90 [2] : vector<1x1x8xf32> to vector<1x1xf32>
    %365 = vector.shape_cast %364 : vector<1x1xf32> to vector<1x1x1xf32>
    %cst_91 = arith.constant 1.000000e-30 : f32
    %366 = vector.broadcast %cst_91 : f32 to vector<1x1x1xf32>
    %367 = arith.addf %365, %366 : vector<1x1x1xf32>
    %368 = math.rsqrt %367 : vector<1x1x1xf32>
    %369 = vector.broadcast %368 : vector<1x1x1xf32> to vector<1x1x8xf32>
    %370 = arith.mulf %360, %369 : vector<1x1x8xf32>
    %371 = arith.mulf %370, %361 : vector<1x1x8xf32>
    %cst_92 = arith.constant dense<0.000000e+00> : vector<1x1xf32>
    %372 = vector.multi_reduction <add>, %371, %cst_92 [2] : vector<1x1x8xf32> to vector<1x1xf32>
    %373 = vector.shape_cast %372 : vector<1x1xf32> to vector<1x1x1xf32>
    %374 = vector.broadcast %373 : vector<1x1x1xf32> to vector<1x1x8xf32>
    %375 = arith.mulf %374, %370 : vector<1x1x8xf32>
    %376 = arith.subf %361, %375 : vector<1x1x8xf32>
    %377 = arith.mulf %376, %376 : vector<1x1x8xf32>
    %cst_93 = arith.constant dense<0.000000e+00> : vector<1x1xf32>
    %378 = vector.multi_reduction <add>, %377, %cst_93 [2] : vector<1x1x8xf32> to vector<1x1xf32>
    %379 = vector.shape_cast %378 : vector<1x1xf32> to vector<1x1x1xf32>
    %cst_94 = arith.constant 1.000000e-30 : f32
    %380 = vector.broadcast %cst_94 : f32 to vector<1x1x1xf32>
    %381 = arith.addf %379, %380 : vector<1x1x1xf32>
    %382 = math.rsqrt %381 : vector<1x1x1xf32>
    %383 = vector.broadcast %382 : vector<1x1x1xf32> to vector<1x1x8xf32>
    %384 = arith.mulf %376, %383 : vector<1x1x8xf32>
    %385 = arith.mulf %370, %362 : vector<1x1x8xf32>
    %cst_95 = arith.constant dense<0.000000e+00> : vector<1x1xf32>
    %386 = vector.multi_reduction <add>, %385, %cst_95 [2] : vector<1x1x8xf32> to vector<1x1xf32>
    %387 = vector.shape_cast %386 : vector<1x1xf32> to vector<1x1x1xf32>
    %388 = vector.broadcast %387 : vector<1x1x1xf32> to vector<1x1x8xf32>
    %389 = arith.mulf %388, %370 : vector<1x1x8xf32>
    %390 = arith.subf %362, %389 : vector<1x1x8xf32>
    %391 = arith.mulf %384, %390 : vector<1x1x8xf32>
    %cst_96 = arith.constant dense<0.000000e+00> : vector<1x1xf32>
    %392 = vector.multi_reduction <add>, %391, %cst_96 [2] : vector<1x1x8xf32> to vector<1x1xf32>
    %393 = vector.shape_cast %392 : vector<1x1xf32> to vector<1x1x1xf32>
    %394 = vector.broadcast %393 : vector<1x1x1xf32> to vector<1x1x8xf32>
    %395 = arith.mulf %394, %384 : vector<1x1x8xf32>
    %396 = arith.subf %390, %395 : vector<1x1x8xf32>
    %397 = arith.mulf %396, %396 : vector<1x1x8xf32>
    %cst_97 = arith.constant dense<0.000000e+00> : vector<1x1xf32>
    %398 = vector.multi_reduction <add>, %397, %cst_97 [2] : vector<1x1x8xf32> to vector<1x1xf32>
    %399 = vector.shape_cast %398 : vector<1x1xf32> to vector<1x1x1xf32>
    %cst_98 = arith.constant 1.000000e-30 : f32
    %400 = vector.broadcast %cst_98 : f32 to vector<1x1x1xf32>
    %401 = arith.addf %399, %400 : vector<1x1x1xf32>
    %402 = math.rsqrt %401 : vector<1x1x1xf32>
    %403 = vector.broadcast %402 : vector<1x1x1xf32> to vector<1x1x8xf32>
    %404 = arith.mulf %396, %403 : vector<1x1x8xf32>
    %405 = tpu.concatenate %370, %384, %404 in 1 : vector<1x1x8xf32>, vector<1x1x8xf32>, vector<1x1x8xf32> -> vector<1x3x8xf32>
    %406 = tpu.concatenate %365, %379, %399 in 1 : vector<1x1x1xf32>, vector<1x1x1xf32>, vector<1x1x1xf32> -> vector<1x3x1xf32>
    %407 = math.sqrt %406 : vector<1x3x1xf32>
    %408 = math.sqrt %407 : vector<1x3x1xf32>
    %409 = vector.broadcast %11 : vector<1x1x1xf32> to vector<1x3x1xf32>
    %410 = arith.mulf %409, %408 : vector<1x3x1xf32>
    %411 = math.sqrt %410 : vector<1x3x1xf32>
    %412 = tpu.iota {dimensions = array<i32: 2>} : vector<1x3x8xi32>
    %413 = math.absf %405 : vector<1x3x8xf32>
    %cst_99 = arith.constant dense<0xFF800000> : vector<1x3xf32>
    %414 = vector.multi_reduction <maximumf>, %413, %cst_99 [2] : vector<1x3x8xf32> to vector<1x3xf32>
    %415 = vector.shape_cast %414 : vector<1x3xf32> to vector<1x3x1xf32>
    %416 = vector.broadcast %415 : vector<1x3x1xf32> to vector<1x3x8xf32>
    %417 = arith.cmpf oge, %413, %416 : vector<1x3x8xf32>
    %c8_i32 = arith.constant 8 : i32
    %418 = vector.broadcast %c8_i32 : i32 to vector<1x3x8xi32>
    %419 = arith.select %417, %412, %418 : vector<1x3x8xi1>, vector<1x3x8xi32>
    %cst_100 = arith.constant dense<2147483647> : vector<1x3xi32>
    %420 = vector.multi_reduction <minsi>, %419, %cst_100 [2] : vector<1x3x8xi32> to vector<1x3xi32>
    %421 = vector.shape_cast %420 : vector<1x3xi32> to vector<1x3x1xi32>
    %422 = vector.broadcast %421 : vector<1x3x1xi32> to vector<1x3x8xi32>
    %423 = arith.cmpi eq, %412, %422 : vector<1x3x8xi32>
    %cst_101 = arith.constant 0.000000e+00 : f32
    %424 = vector.broadcast %cst_101 : f32 to vector<1x3x8xf32>
    %425 = arith.select %423, %405, %424 : vector<1x3x8xi1>, vector<1x3x8xf32>
    %cst_102 = arith.constant dense<0.000000e+00> : vector<1x3xf32>
    %426 = vector.multi_reduction <add>, %425, %cst_102 [2] : vector<1x3x8xf32> to vector<1x3xf32>
    %427 = vector.shape_cast %426 : vector<1x3xf32> to vector<1x3x1xf32>
    %cst_103 = arith.constant 0.000000e+00 : f32
    %428 = vector.broadcast %cst_103 : f32 to vector<1x3x1xf32>
    %429 = arith.cmpf oge, %427, %428 : vector<1x3x1xf32>
    %cst_104 = arith.constant 1.000000e+00 : f32
    %cst_105 = arith.constant -1.000000e+00 : f32
    %430 = vector.broadcast %cst_104 : f32 to vector<1x3x1xf32>
    %431 = vector.broadcast %cst_105 : f32 to vector<1x3x1xf32>
    %432 = arith.select %429, %430, %431 : vector<1x3x1xi1>, vector<1x3x1xf32>
    %433 = vector.broadcast %11 : vector<1x1x1xf32> to vector<1x3x1xf32>
    %434 = arith.mulf %433, %408 : vector<1x3x1xf32>
    %cst_106 = arith.constant dense<0.000000e+00> : vector<1x1xf32>
    %435 = vector.multi_reduction <add>, %434, %cst_106 [1] : vector<1x3x1xf32> to vector<1x1xf32>
    %436 = vector.shape_cast %435 : vector<1x1xf32> to vector<1x1x1xf32>
    %cst_107 = arith.constant 1.000000e-24 : f32
    %437 = vector.broadcast %cst_107 : f32 to vector<1x1x1xf32>
    %438 = arith.maximumf %436, %437 : vector<1x1x1xf32>
    %439 = math.rsqrt %438 : vector<1x1x1xf32>
    %440 = arith.mulf %432, %411 : vector<1x3x1xf32>
    %441 = vector.broadcast %439 : vector<1x1x1xf32> to vector<1x3x1xf32>
    %442 = arith.mulf %440, %441 : vector<1x3x1xf32>
    %443 = vector.broadcast %442 : vector<1x3x1xf32> to vector<1x3x8xf32>
    %444 = arith.mulf %405, %443 : vector<1x3x8xf32>
    %c0_108 = arith.constant 0 : index
    %c0_109 = arith.constant 0 : index
    %c0_110 = arith.constant 0 : index
    %445 = vector.load %arg3[%c0_108, %c0_109, %c0_110] : memref<1x3x8xf32, #tpu.memory_space<vmem>>, vector<1x3x8xf32>
    tpu.vector_store %arg3[%c0_108, %c0_109, %c0_110], %444 {strides = array<i32>} : memref<1x3x8xf32, #tpu.memory_space<vmem>>, vector<1x3x8xf32>,
    return
  }
  func.func @transform_0(%arg0: i32) -> (i32, i32, i32) {
    %c0_i32 = arith.constant 0 : i32
    %c0_i32_0 = arith.constant 0 : i32
    %c0_i32_1 = arith.constant 0 : i32
    return %arg0, %c0_i32, %c0_i32_0 : i32, i32, i32
  }
  func.func @transform_1(%arg0: i32) -> (i32, i32) {
    %c0_i32 = arith.constant 0 : i32
    %c0_i32_0 = arith.constant 0 : i32
    %c0_i32_1 = arith.constant 0 : i32
    return %c0_i32, %c0_i32_0 : i32, i32
  }
  func.func @transform_2(%arg0: i32) -> (i32, i32, i32) {
    %c0_i32 = arith.constant 0 : i32
    %c0_i32_0 = arith.constant 0 : i32
    %c0_i32_1 = arith.constant 0 : i32
    return %arg0, %c0_i32, %c0_i32_0 : i32, i32, i32
  }
}

</mosaic_0001>

<bundles_post_ra>
// kernel: tpu_custom_call.1
= control target key start
LH: loop header
LB: loop body
LE: loop exit
PB: predicated region body
PF: predicated region fallthrough
CT: control target
= control target key end

     0   :  { %7 = vsyncpa [#allocation3], 0  ;;  %s1993_s0 = inlined_call_operand.hbm [shape: f32[4,8,256], index: 0, kind: input, shape index: {}]   ;;  %s1994_s1 = inlined_call_operand.hbm [shape: f32[3,8], index: 1, kind: input, shape index: {}]   ;;  %s1995_s2 = inlined_call_operand.vmem [shape: f32[4,3,8], index: 2, kind: output, shape index: {}]  }
   0x1   :  { %9 = vsyncpa [#allocation3 + $0x1], 0 }
   0x2   :  { %10 = vsyncpa [#allocation5], 0  ;;  %s1762_s9 = smov 0   ;;  %s1764_s10 = smov 0  }
   0x3   :  { %s1766_s11 = smov 0   ;;  %s1768_s12 = smov 0  }
   0x4 LB: > { %s1781_s13 = sadd.s32 4294967295, %s1741_s12   ;;  %p36_p0 = scmp.ne.s32.totalorder %s1733_s10, %s1729_s9  ;;  %s1741_s12 = sphi %s1768_s12, %s2002_s12   ;;  %s1737_s11 = sphi %s1766_s11, %s2001_s11   ;;  %s1733_s10 = sphi %s1764_s10, %s2000_s10   ;;  %s1729_s9 = sphi %s1762_s9, %s1999_s9  }
   0x5   : > { %p37_p1 = scmp.eq.s32.totalorder %s1781_s13, 0  ;;  %p1499_p2 = scmp.ge.s32.totalorder %s1741_s12, 1 }
   0x6   : > { %p94_p3 = scmp.lt.s32.totalorder %s1741_s12, 5  ;;  %s106_s17 = sshll.u32 %s1994_s1, 4  ;;  %s107_s17 = int_to_ptr.hbm [resolvable:$true] %s106_s17 }
   0x7   : > { %p1789_p4 = por %p37_p1, %p36_p0  ;;  %s1743_s19 = smov [#allocation4]  }
   0x8   : > { %p1796_p5 = pnand %p1499_p2, %p94_p3  ;;  %s108_s20 = sshll.u32 %s1743_s19, 4  ;;  %s109_s20 = int_to_ptr.vmem [resolvable:$true] %s108_s20 }
   0x9   : > { %s1805_s21 = sadd.s32 1, %s1741_s12   ;;  %s23_s22 = sadd.s32 1, %s1737_s11 }
   0xa   : > { %p1534_p6 = pneg %p1796_p5  ;;  %s20_s23 = ssub.s32 %s1741_s12, %s1805_s21 }
   0xb   : > { %p21_p8 = scmp.eq.s32.totalorder %s20_s23, 0  ;;  %p30_p9 = scmp.ne.s32.totalorder %s1737_s11, %s1733_s10 }
   0xc   : > { %p1535_p7 = pnand %p1534_p6, %p37_p1  ;;  %p31_p10 = scmp.eq.s32.totalorder %s1741_s12, 0 }
   0xd   : > { %p1543_p11 = scmp.lt.s32.totalorder %s1741_s12, 4  ;;  %s119_s25 = sand.u32 1, %s1737_s11  }
   0xe   : > { %1537 = dma.hbm_to_vmem [thread:$0]  (!%p1535_p7), %s107_s17, 64, %s109_s20, [#allocation5]  }
   0xf   : > { %s1815_s24 = scalar_select %p21_p8, %s1737_s11, %s23_s22  }
  0x10   : > { %p32_p12 = por %p31_p10, %p30_p9  ;;  %s1502_s26 = sshll.u32 %s119_s25, 4 }
  0x11   : > { %s1527_s27 = sshll.u32 %s1741_s12, 4  ;;  %s123_s3 = scalar_lea.vmem [#allocation2], %s1502_s26 }
  0x12   : > { %s128_s30 = scalar_lea.hbm %s1993_s0, %s1527_s27  ;;  %s132_s4 = sshll.u32 %s123_s3, 4  ;;  %s133_s4 = int_to_ptr.vmem [resolvable:$true] %s132_s4 }
  0x13   : > { %s130_s5 = sshll.u32 %s128_s30, 4  ;;  %p1822_p13 = pnand %p1543_p11, %p32_p12  ;;  %s131_s5 = int_to_ptr.hbm [resolvable:$true] %s130_s5 }
  0x14   : > { %s120_s7 = scalar_lea.sflag [#allocation3], %s119_s25  ;;  %s1673_s8 = sshra.s32 %s131_s5, 4  ;;  %s1674_s8 = int_to_ptr.hbm [resolvable:$true] %s1673_s8 }
  0x15   : > { %s1675_s9 = scalar_lea.hbm %s1674_s8, 16  ;;  %p1677_p2 = pneg %p1822_p13 }
  0x16   : > { %p1676_p0 = scmp.ne.s32.totalorder %s1674_s8, %s1675_s9  ;;  %s1680_s16 = scalar_lea.hbm %s1993_s0, 64 }
  0x17   : > { %p1681_p7 = scmp.lt.s32.totalorder %s1674_s8, %s1993_s0  ;;  %p1682_p8 = scmp.lt.s32.totalorder %s1680_s16, %s1675_s9 }
  0x18   : > { %p1678_p3 = pnand %p1677_p2, %p1676_p0 }
  0x19   : > { %p1683_p9 = por %p1682_p8, %p1681_p7 }
  0x1a   : > { %p1679_p6 = pneg %p1678_p3 }
  0x1c   : > { %p1684_p10 = pnand %p1683_p9, %p1679_p6 }
  0x1e   : > { %1687 = shalt.err (!%p1684_p10)
}
  0x1f   : > { %1541 = dma.hbm_to_vmem [thread:$0]  (!%p1822_p13), %s131_s5, 256, %s133_s4, %s120_s7  }
  0x20   : > { %141 = sbr.rel (%p1796_p5) target bundleno = 8267 (0x204b), region = 28  ;;  %s143_s20 = sand.u32 (!%p1796_p5), 1, %s1733_s10  }
  0x21   : > { %s1506_s22 = sshll.u32 (!%p1796_p5), %s143_s20, 4  ;;  %s144_s23 = scalar_lea.sflag (!%p1796_p5), [#allocation3], %s143_s20 }
  0x22   : > { %s147_s25 = scalar_lea.vmem (!%p1796_p5), [#allocation2], %s1506_s22 }
  0x25   : > { %1720 = dma.done.wait (%p1789_p4), %s144_s23, 256  }
  0x26   : > { %1722 = vsyncadd (%p1789_p4), %s144_s23, 4294967040 }
  0x27   : > { %1724 = dma.done.wait (%p37_p1), [#allocation5], 64  }
  0x28   : > { %1726 = vsyncadd (%p37_p1), [#allocation5], 4294967232  ;;  %v1744_v0 = vmov 8.0   ;;  %v177_v2 = vld [vmem:[%s147_s25] sm:$0xff]  ;;  %v178_v3 = vld [vmem:[%s147_s25 + $0x8] sm:$0xff]  ;;  %vm271_vm5 = vcmask 64512  }
  0x29   : > { %1583 = vrcp.f32 %v1744_v0  ;;  %v179_v4 = vrot.slane %v177_v2, 4  ;;  %v185_v5 = vrot.slane %v178_v3, 4  ;;  %v270_v50 = vld [vmem:[#allocation4] sm:$0x7]  ;;  %vm319_vm6 = vcmask 57344   ;;  %p173_p1 = scmp.lt.s32.totalorder %s1781_s13, 3 }
  0x2a   : > { %vm348_vm10 = vcmask 58369   ;;  %vm388_vm14 = vcmask 59394  }
  0x2b   : > { %v180_v7 = vadd.f32 %v179_v4, %v177_v2  ;;  %v186_v8 = vadd.f32 %v185_v5, %v178_v3  ;;  %s2004_s13 = smov (!%p173_p1, %s1781_s13), 3 }
  0x2c   : > { %s1508_s14 = sshll.u32 %s2004_s13, 2 }
  0x2d   : > { %v181_v10 = vrot.slane %v180_v7, 2  ;;  %v187_v11 = vrot.slane %v186_v8, 2  ;;  %s176_s27 = scalar_lea.vmem %s1995_s2, %s1508_s14 }
  0x2f   : > { %v1584_v1 = vpop.eup %1583  ;;  %v182_v13 = vadd.f32 %v181_v10, %v180_v7  ;;  %v188_v14 = vadd.f32 %v187_v11, %v186_v8 }
  0x30   : > { %v192_v6 = vmul.f32 8.0, %v1584_v1  ;;  %vm196_vm0 = vweird.f32 %v1584_v1 }
  0x31   : > { %v183_v16 = vrot.slane %v182_v13, 1  ;;  %v189_v17 = vrot.slane %v188_v14, 1 }
  0x32   : > { %v193_v9 = vsub.f32 1.0, %v192_v6 }
  0x33   : > { %v184_v19 = vadd.f32 %v183_v16, %v182_v13  ;;  %v190_v20 = vadd.f32 %v189_v17, %v188_v14 }
  0x34   : > { %v194_v12 = vmul.f32 %v1584_v1, %v193_v9 }
  0x36   : > { %v195_v15 = vadd.f32 %v1584_v1, %v194_v12 }
  0x38   : > { %v197_v18 = vsel %vm196_vm0, %v1584_v1, %v195_v15 }
  0x39   : > { %v198_v21 = vmul.f32 %v197_v18, %v184_v19  ;;  %v199_v22 = vmul.f32 %v197_v18, %v190_v20 }
  0x3b   : > { %v200_v23 = vsub.f32 %v177_v2, %v198_v21  ;;  %v201_v24 = vsub.f32 %v178_v3, %v199_v22 }
  0x3d   : > { %v202_v25 = vmul.f32 %v200_v23, %v200_v23  ;;  %v203_v26 = vmul.f32 %v201_v24, %v201_v24  ;;  %244 = vmatpush.xpose.msra.mxu0 %v200_v23  ;;  %264 = vmatpush.xpose.msra.mxu1 %v201_v24 }
  0x3f   : > { %v204_v27 = vadd.f32 %v203_v26, %v202_v25 }
  0x40   : > { %245 = vmatmul.f32.vlgmr.msra.gmra.mxu0 %v200_v23  ;;  %265 = vmatmul.f32.vlgmr.msra.gmra.mxu1 %v201_v24 }
  0x41   : > { %205 = vadd.xlane.f32.xlu0 %v204_v27 }
  0xb4   : > { %v206_v28 = vpop.xlane.xlu0 %205 }
  0xb5   : > { %v207_v29 = vrot.slane %v206_v28, 4 }
  0xb7   : > { %v208_v30 = vadd.f32 %v207_v29, %v206_v28 }
  0xb9   : > { %v209_v31 = vrot.slane %v208_v30, 2 }
  0xbb   : > { %v210_v32 = vadd.f32 %v209_v31, %v208_v30 }
  0xbd   : > { %v211_v33 = vrot.slane %v210_v32, 1  ;;  %v246_v39 = vpop.f32.mrf.mxu0  ;;  %v266_v41 = vpop.f32.mrf.mxu1 }
  0xbe   : > { %v267_v45 = vadd.f32 %v266_v41, %v246_v39 }
  0xbf   : > { %v1847_v34 = vadd.f32 %v211_v33, %v210_v32 }
  0xc1   : > { %v213_v35 = vmax.f32 %v1847_v34, 1e-30 }
  0xc3   : > { %1585 = vrcp.f32 %v213_v35  ;;  %v225_v40 = vand.u32 2147483648, %v213_v35  ;;  %v223_v43 = vand.u32 2147483647, %v213_v35  ;;  %vm219_vm2 = vweird.f32 %v213_v35 }
  0xc5   : > { %v226_v46 = vor.u32 1.1754944e-38, %v225_v40  ;;  %vm224_vm4 = vcmp.eq.f32.partialorder %v223_v43, 8.507059e+37 }
  0xc9   : > { %v1586_v36 = vpop.eup %1585 }
  0xca   : > { %v215_v37 = vmul.f32 %v1586_v36, %v213_v35  ;;  %vm220_vm1 = vweird.f32 %v1586_v36 }
  0xcb   : > { %vm221_vm3 = vmor %vm219_vm2, %vm220_vm1  ;;  %vm404_vm2 = vcmask 1040384  }
  0xcc   : > { %v216_v38 = vsub.f32 1.0, %v215_v37 }
  0xce   : > { %v217_v42 = vmul.f32 %v1586_v36, %v216_v38 }
  0xd0   : > { %v218_v44 = vadd.f32 %v1586_v36, %v217_v42 }
  0xd2   : > { %v222_v47 = vsel %vm221_vm3, %v1586_v36, %v218_v44  ;;  %vm406_vm3 = vcmask 1041408  }
  0xd3   : > { %v227_v48 = vsel %vm224_vm4, %v226_v46, %v222_v47 }
  0xd4   : > { %v1850_v49 = vmul.f32 %v267_v45, %v227_v48 }
  0xd6   : > { %290 = vmatpush.msra.mxu2 %v1850_v49  ;;  %313 = vmatpush.msra.mxu3 %v1850_v49 }
  0xd7   : > { %557 = vmatpush.msrb.mxu0 %v1850_v49  ;;  %580 = vmatpush.msrb.mxu1 %v1850_v49 }
  0xd8   : > { %1509 = vmatmul.msk.f32.vlgmr.msra.gmra.mxu2 %vm271_vm5, %v270_v50  ;;  %449 = vmatpush.msrb.mxu3 %v1850_v49 }
  0xd9   : > { %426 = vmatpush.msrb.mxu2 %v1850_v49  ;;  %819 = vmatpush.msra.mxu0 %v1850_v49 }
  0xda   : > { %842 = vmatpush.msra.mxu1 %v1850_v49 }
  0xdb   : > { %688 = vmatpush.msra.mxu2 %v1850_v49 }
 0x15b   : > { %v292_v51 = vpop.f32.mrf.mxu2 }
 0x15c   : > { %1510 = vmatmul.msk.f32.vlgmr.msra.gmra.mxu3 %vm271_vm5, %v292_v51 }
 0x15d   : > { %711 = vmatpush.msra.mxu3 %v1850_v49 }
 0x1df   : > { %v315_v52 = vpop.f32.mrf.mxu3 }
 0x1e0   : > { %v318_v53 = vmul.f32 %v315_v52, %v315_v52  ;;  %v364_v1 = vrot.slane %v315_v52, 2  ;;  %v336_v2 = vrot.slane %v315_v52, 1 }
 0x1e2   : > { %v320_v54 = vsel %vm319_vm6, %v318_v53, 0.0 }
 0x1e3   : > { %321 = vadd.xlane.f32.xlu0 %v320_v54 }
 0x256   : > { %v322_v55 = vpop.xlane.xlu0 %321 }
 0x257   : > { %v323_v56 = vadd.f32 1e-30, %v322_v55 }
 0x259   : > { %1587 = vrsqrt.f32 %v323_v56  ;;  %vm330_vm8 = vweird.f32 %v323_v56 }
 0x25f   : > { %v1588_v57 = vpop.eup %1587 }
 0x260   : > { %v325_v58 = vmul.f32 %v1588_v57, %v323_v56  ;;  %vm331_vm7 = vweird.f32 %v1588_v57 }
 0x261   : > { %vm332_vm9 = vmor %vm330_vm8, %vm331_vm7 }
 0x262   : > { %v326_v59 = vmul.f32 %v1588_v57, %v325_v58 }
 0x264   : > { %v327_v60 = vmul.f32 0.5, %v326_v59 }
 0x266   : > { %v328_v61 = vsub.f32 1.5, %v327_v60 }
 0x268   : > { %v329_v62 = vmul.f32 %v1588_v57, %v328_v61 }
 0x26a   : > { %v333_v63 = vsel %vm332_vm9, %v1588_v57, %v329_v62 }
 0x26b   : > { %v1865_v0 = vmul.f32 %v333_v63, %v315_v52 }
 0x26d   : > { %v366_v3 = vmul.f32 %v364_v1, %v1865_v0  ;;  %v338_v4 = vmul.f32 %v336_v2, %v1865_v0 }
 0x26f   : > { %v367_v5 = vsel %vm319_vm6, %v366_v3, 0.0  ;;  %v339_v6 = vsel %vm319_vm6, %v338_v4, 0.0 }
 0x270   : > { %368 = vadd.xlane.f32.xlu2 %v367_v5  ;;  %340 = vadd.xlane.f32.xlu1 %v339_v6 }
 0x2e3   : > { %v341_v7 = vpop.xlane.xlu1 %340  ;;  %v369_v15 = vpop.xlane.xlu2 %368 }
 0x2e4   : > { %v342_v8 = vmul.f32 %v341_v7, %v1865_v0  ;;  %v370_v17 = vmul.f32 %v369_v15, %v1865_v0 }
 0x2e6   : > { %v344_v9 = vrot.slane %v342_v8, 7  ;;  %v372_v20 = vrot.slane %v370_v17, 6 }
 0x2e8   : > { %v346_v10 = vsub.f32 %v315_v52, %v344_v9  ;;  %v374_v23 = vsub.f32 %v315_v52, %v372_v20 }
 0x2ea   : > { %v347_v11 = vmul.f32 %v346_v10, %v346_v10  ;;  %v376_v27 = vrot.slane %v374_v23, 1 }
 0x2ec   : > { %v349_v12 = vsel %vm348_vm10, %v347_v11, 0.0 }
 0x2ed   : > { %350 = vadd.xlane.f32.xlu1 %v349_v12 }
 0x360   : > { %v351_v13 = vpop.xlane.xlu1 %350 }
 0x361   : > { %v352_v14 = vadd.f32 1e-30, %v351_v13 }
 0x363   : > { %1589 = vrsqrt.f32 %v352_v14  ;;  %vm359_vm12 = vweird.f32 %v352_v14 }
 0x369   : > { %v1590_v16 = vpop.eup %1589 }
 0x36a   : > { %v354_v18 = vmul.f32 %v1590_v16, %v352_v14  ;;  %vm360_vm11 = vweird.f32 %v1590_v16 }
 0x36b   : > { %vm361_vm13 = vmor %vm359_vm12, %vm360_vm11 }
 0x36c   : > { %v355_v19 = vmul.f32 %v1590_v16, %v354_v18 }
 0x36e   : > { %v356_v21 = vmul.f32 0.5, %v355_v19 }
 0x370   : > { %v357_v22 = vsub.f32 1.5, %v356_v21 }
 0x372   : > { %v358_v24 = vmul.f32 %v1590_v16, %v357_v22 }
 0x374   : > { %v362_v25 = vsel %vm361_vm13, %v1590_v16, %v358_v24 }
 0x375   : > { %v363_v26 = vmul.f32 %v362_v25, %v346_v10 }
 0x377   : > { %v378_v28 = vmul.f32 %v376_v27, %v363_v26  ;;  %v405_v47 = vsel %vm404_vm2, %v1865_v0, %v363_v26 }
 0x379   : > { %v379_v29 = vsel %vm348_vm10, %v378_v28, 0.0 }
 0x37a   : > { %380 = vadd.xlane.f32.xlu2 %v379_v29 }
 0x3ed   : > { %v381_v30 = vpop.xlane.xlu2 %380 }
 0x3ee   : > { %v382_v31 = vmul.f32 %v381_v30, %v363_v26 }
 0x3f0   : > { %v384_v32 = vrot.slane %v382_v31, 7 }
 0x3f2   : > { %v386_v33 = vsub.f32 %v374_v23, %v384_v32 }
 0x3f4   : > { %v387_v35 = vmul.f32 %v386_v33, %v386_v33 }
 0x3f6   : > { %v389_v36 = vsel %vm388_vm14, %v387_v35, 0.0 }
 0x3f7   : > { %390 = vadd.xlane.f32.xlu0 %v389_v36 }
 0x46a   : > { %v391_v37 = vpop.xlane.xlu0 %390 }
 0x46b   : > { %v392_v38 = vadd.f32 1e-30, %v391_v37 }
 0x46d   : > { %1591 = vrsqrt.f32 %v392_v38  ;;  %vm399_vm0 = vweird.f32 %v392_v38 }
 0x473   : > { %v1592_v39 = vpop.eup %1591 }
 0x474   : > { %v394_v40 = vmul.f32 %v1592_v39, %v392_v38  ;;  %vm400_vm15 = vweird.f32 %v1592_v39 }
 0x475   : > { %vm401_vm1 = vmor %vm399_vm0, %vm400_vm15 }
 0x476   : > { %v395_v41 = vmul.f32 %v1592_v39, %v394_v40 }
 0x478   : > { %v396_v42 = vmul.f32 0.5, %v395_v41 }
 0x47a   : > { %v397_v43 = vsub.f32 1.5, %v396_v42 }
 0x47c   : > { %v398_v44 = vmul.f32 %v1592_v39, %v397_v43 }
 0x47e   : > { %v402_v45 = vsel %vm401_vm1, %v1592_v39, %v398_v44 }
 0x47f   : > { %v403_v46 = vmul.f32 %v402_v45, %v386_v33 }
 0x481   : > { %v407_v48 = vsel %vm406_vm3, %v405_v47, %v403_v46 }
 0x482   : > { %1511 = vmatmul.msk.f32.vlgmr.msrb.gmra.mxu2 %vm271_vm5, %v407_v48 }
 0x483   : > { %950 = vmatpush.msrb.mxu2 %v1850_v49 }
 0x505   : > { %v428_v50 = vpop.f32.mrf.mxu2 }
 0x506   : > { %1512 = vmatmul.msk.f32.vlgmr.msrb.gmra.mxu3 %vm271_vm5, %v428_v50 }
 0x507   : > { %973 = vmatpush.msrb.mxu3 %v1850_v49 }
 0x589   : > { %v451_v51 = vpop.f32.mrf.mxu3 }
 0x58a   : > { %v454_v52 = vmul.f32 %v451_v51, %v451_v51  ;;  %v498_v0 = vrot.slane %v451_v51, 2  ;;  %v471_v1 = vrot.slane %v451_v51, 1 }
 0x58c   : > { %v455_v53 = vsel %vm319_vm6, %v454_v52, 0.0 }
 0x58d   : > { %456 = vadd.xlane.f32.xlu1 %v455_v53 }
 0x600   : > { %v457_v54 = vpop.xlane.xlu1 %456 }
 0x601   : > { %v458_v55 = vadd.f32 1e-30, %v457_v54 }
 0x603   : > { %1593 = vrsqrt.f32 %v458_v55  ;;  %vm465_vm7 = vweird.f32 %v458_v55 }
 0x609   : > { %v1594_v56 = vpop.eup %1593 }
 0x60a   : > { %v460_v57 = vmul.f32 %v1594_v56, %v458_v55  ;;  %vm466_vm4 = vweird.f32 %v1594_v56 }
 0x60b   : > { %vm467_vm8 = vmor %vm465_vm7, %vm466_vm4 }
 0x60c   : > { %v461_v58 = vmul.f32 %v1594_v56, %v460_v57 }
 0x60e   : > { %v462_v59 = vmul.f32 0.5, %v461_v58 }
 0x610   : > { %v463_v60 = vsub.f32 1.5, %v462_v59 }
 0x612   : > { %v464_v61 = vmul.f32 %v1594_v56, %v463_v60 }
 0x614   : > { %v468_v62 = vsel %vm467_vm8, %v1594_v56, %v464_v61 }
 0x615   : > { %v469_v63 = vmul.f32 %v468_v62, %v451_v51 }
 0x617   : > { %v500_v2 = vmul.f32 %v498_v0, %v469_v63  ;;  %v473_v3 = vmul.f32 %v471_v1, %v469_v63 }
 0x619   : > { %v501_v4 = vsel %vm319_vm6, %v500_v2, 0.0  ;;  %v474_v5 = vsel %vm319_vm6, %v473_v3, 0.0 }
 0x61a   : > { %502 = vadd.xlane.f32.xlu1 %v501_v4  ;;  %475 = vadd.xlane.f32.xlu2 %v474_v5 }
 0x68d   : > { %v476_v6 = vpop.xlane.xlu2 %475  ;;  %v503_v14 = vpop.xlane.xlu1 %502 }
 0x68e   : > { %v477_v7 = vmul.f32 %v476_v6, %v469_v63  ;;  %v504_v16 = vmul.f32 %v503_v14, %v469_v63 }
 0x690   : > { %v479_v8 = vrot.slane %v477_v7, 7  ;;  %v506_v19 = vrot.slane %v504_v16, 6 }
 0x692   : > { %v481_v9 = vsub.f32 %v451_v51, %v479_v8  ;;  %v508_v22 = vsub.f32 %v451_v51, %v506_v19 }
 0x694   : > { %v482_v10 = vmul.f32 %v481_v9, %v481_v9  ;;  %v510_v26 = vrot.slane %v508_v22, 1 }
 0x696   : > { %v483_v11 = vsel %vm348_vm10, %v482_v10, 0.0 }
 0x697   : > { %484 = vadd.xlane.f32.xlu0 %v483_v11 }
 0x70a   : > { %v485_v12 = vpop.xlane.xlu0 %484 }
 0x70b   : > { %v486_v13 = vadd.f32 1e-30, %v485_v12 }
 0x70d   : > { %1595 = vrsqrt.f32 %v486_v13  ;;  %vm493_vm11 = vweird.f32 %v486_v13 }
 0x713   : > { %v1596_v15 = vpop.eup %1595 }
 0x714   : > { %v488_v17 = vmul.f32 %v1596_v15, %v486_v13  ;;  %vm494_vm9 = vweird.f32 %v1596_v15 }
 0x715   : > { %vm495_vm12 = vmor %vm493_vm11, %vm494_vm9 }
 0x716   : > { %v489_v18 = vmul.f32 %v1596_v15, %v488_v17 }
 0x718   : > { %v490_v20 = vmul.f32 0.5, %v489_v18 }
 0x71a   : > { %v491_v21 = vsub.f32 1.5, %v490_v20 }
 0x71c   : > { %v492_v23 = vmul.f32 %v1596_v15, %v491_v21 }
 0x71e   : > { %v496_v24 = vsel %vm495_vm12, %v1596_v15, %v492_v23 }
 0x71f   : > { %v497_v25 = vmul.f32 %v496_v24, %v481_v9 }
 0x721   : > { %v512_v27 = vmul.f32 %v510_v26, %v497_v25  ;;  %v537_v46 = vsel %vm404_vm2, %v469_v63, %v497_v25 }
 0x723   : > { %v513_v28 = vsel %vm348_vm10, %v512_v27, 0.0 }
 0x724   : > { %514 = vadd.xlane.f32.xlu2 %v513_v28 }
 0x797   : > { %v515_v29 = vpop.xlane.xlu2 %514 }
 0x798   : > { %v516_v30 = vmul.f32 %v515_v29, %v497_v25 }
 0x79a   : > { %v518_v31 = vrot.slane %v516_v30, 7 }
 0x79c   : > { %v520_v32 = vsub.f32 %v508_v22, %v518_v31 }
 0x79e   : > { %v521_v33 = vmul.f32 %v520_v32, %v520_v32 }
 0x7a0   : > { %v522_v35 = vsel %vm388_vm14, %v521_v33, 0.0 }
 0x7a1   : > { %523 = vadd.xlane.f32.xlu0 %v522_v35 }
 0x814   : > { %v524_v36 = vpop.xlane.xlu0 %523 }
 0x815   : > { %v525_v37 = vadd.f32 1e-30, %v524_v36 }
 0x817   : > { %1597 = vrsqrt.f32 %v525_v37  ;;  %vm532_vm15 = vweird.f32 %v525_v37 }
 0x81d   : > { %v1598_v38 = vpop.eup %1597 }
 0x81e   : > { %v527_v39 = vmul.f32 %v1598_v38, %v525_v37  ;;  %vm533_vm13 = vweird.f32 %v1598_v38 }
 0x81f   : > { %vm534_vm0 = vmor %vm532_vm15, %vm533_vm13 }
 0x820   : > { %v528_v40 = vmul.f32 %v1598_v38, %v527_v39 }
 0x822   : > { %v529_v41 = vmul.f32 0.5, %v528_v40 }
 0x824   : > { %v530_v42 = vsub.f32 1.5, %v529_v41 }
 0x826   : > { %v531_v43 = vmul.f32 %v1598_v38, %v530_v42 }
 0x828   : > { %v535_v44 = vsel %vm534_vm0, %v1598_v38, %v531_v43 }
 0x829   : > { %v536_v45 = vmul.f32 %v535_v44, %v520_v32 }
 0x82b   : > { %v538_v47 = vsel %vm406_vm3, %v537_v46, %v536_v45 }
 0x82c   : > { %1513 = vmatmul.msk.f32.vlgmr.msrb.gmra.mxu0 %vm271_vm5, %v538_v47 }
 0x82d   : > { %1081 = vmatpush.msrb.mxu0 %v1850_v49 }
 0x8a9   : > { %v559_v48 = vpop.f32.mrf.mxu0 }
 0x8aa   : > { %1514 = vmatmul.msk.f32.vlgmr.msrb.gmra.mxu1 %vm271_vm5, %v559_v48 }
 0x8ab   : > { %1104 = vmatpush.msrb.mxu1 %v1850_v49 }
 0x927   : > { %v582_v50 = vpop.f32.mrf.mxu1 }
 0x928   : > { %v585_v51 = vmul.f32 %v582_v50, %v582_v50  ;;  %v629_v63 = vrot.slane %v582_v50, 2  ;;  %v602_v0 = vrot.slane %v582_v50, 1 }
 0x92a   : > { %v586_v52 = vsel %vm319_vm6, %v585_v51, 0.0 }
 0x92b   : > { %587 = vadd.xlane.f32.xlu1 %v586_v52 }
 0x99e   : > { %v588_v53 = vpop.xlane.xlu1 %587 }
 0x99f   : > { %v589_v54 = vadd.f32 1e-30, %v588_v53 }
 0x9a1   : > { %1599 = vrsqrt.f32 %v589_v54  ;;  %vm596_vm4 = vweird.f32 %v589_v54 }
 0x9a7   : > { %v1600_v55 = vpop.eup %1599 }
 0x9a8   : > { %v591_v56 = vmul.f32 %v1600_v55, %v589_v54  ;;  %vm597_vm1 = vweird.f32 %v1600_v55 }
 0x9a9   : > { %vm598_vm7 = vmor %vm596_vm4, %vm597_vm1 }
 0x9aa   : > { %v592_v57 = vmul.f32 %v1600_v55, %v591_v56 }
 0x9ac   : > { %v593_v58 = vmul.f32 0.5, %v592_v57 }
 0x9ae   : > { %v594_v59 = vsub.f32 1.5, %v593_v58 }
 0x9b0   : > { %v595_v60 = vmul.f32 %v1600_v55, %v594_v59 }
 0x9b2   : > { %v599_v61 = vsel %vm598_vm7, %v1600_v55, %v595_v60 }
 0x9b3   : > { %v600_v62 = vmul.f32 %v599_v61, %v582_v50 }
 0x9b5   : > { %v631_v1 = vmul.f32 %v629_v63, %v600_v62  ;;  %v604_v2 = vmul.f32 %v602_v0, %v600_v62 }
 0x9b7   : > { %v632_v3 = vsel %vm319_vm6, %v631_v1, 0.0  ;;  %v605_v4 = vsel %vm319_vm6, %v604_v2, 0.0 }
 0x9b8   : > { %633 = vadd.xlane.f32.xlu1 %v632_v3  ;;  %606 = vadd.xlane.f32.xlu2 %v605_v4 }
 0xa2b   : > { %v607_v5 = vpop.xlane.xlu2 %606  ;;  %v634_v13 = vpop.xlane.xlu1 %633 }
 0xa2c   : > { %v608_v6 = vmul.f32 %v607_v5, %v600_v62  ;;  %v635_v15 = vmul.f32 %v634_v13, %v600_v62 }
 0xa2e   : > { %v610_v7 = vrot.slane %v608_v6, 7  ;;  %v637_v18 = vrot.slane %v635_v15, 6 }
 0xa30   : > { %v612_v8 = vsub.f32 %v582_v50, %v610_v7  ;;  %v639_v21 = vsub.f32 %v582_v50, %v637_v18 }
 0xa32   : > { %v613_v9 = vmul.f32 %v612_v8, %v612_v8  ;;  %v641_v25 = vrot.slane %v639_v21, 1 }
 0xa34   : > { %v614_v10 = vsel %vm348_vm10, %v613_v9, 0.0 }
 0xa35   : > { %615 = vadd.xlane.f32.xlu0 %v614_v10 }
 0xaa8   : > { %v616_v11 = vpop.xlane.xlu0 %615 }
 0xaa9   : > { %v617_v12 = vadd.f32 1e-30, %v616_v11 }
 0xaab   : > { %1601 = vrsqrt.f32 %v617_v12  ;;  %vm624_vm9 = vweird.f32 %v617_v12 }
 0xab1   : > { %v1602_v14 = vpop.eup %1601 }
 0xab2   : > { %v619_v16 = vmul.f32 %v1602_v14, %v617_v12  ;;  %vm625_vm8 = vweird.f32 %v1602_v14 }
 0xab3   : > { %vm626_vm11 = vmor %vm624_vm9, %vm625_vm8 }
 0xab4   : > { %v620_v17 = vmul.f32 %v1602_v14, %v619_v16 }
 0xab6   : > { %v621_v19 = vmul.f32 0.5, %v620_v17 }
 0xab8   : > { %v622_v20 = vsub.f32 1.5, %v621_v19 }
 0xaba   : > { %v623_v22 = vmul.f32 %v1602_v14, %v622_v20 }
 0xabc   : > { %v627_v23 = vsel %vm626_vm11, %v1602_v14, %v623_v22 }
 0xabd   : > { %v628_v24 = vmul.f32 %v627_v23, %v612_v8 }
 0xabf   : > { %v643_v26 = vmul.f32 %v641_v25, %v628_v24  ;;  %v668_v45 = vsel %vm404_vm2, %v600_v62, %v628_v24 }
 0xac1   : > { %v644_v27 = vsel %vm348_vm10, %v643_v26, 0.0 }
 0xac2   : > { %645 = vadd.xlane.f32.xlu2 %v644_v27 }
 0xb35   : > { %v646_v28 = vpop.xlane.xlu2 %645 }
 0xb36   : > { %v647_v29 = vmul.f32 %v646_v28, %v628_v24 }
 0xb38   : > { %v649_v30 = vrot.slane %v647_v29, 7 }
 0xb3a   : > { %v651_v31 = vsub.f32 %v639_v21, %v649_v30 }
 0xb3c   : > { %v652_v32 = vmul.f32 %v651_v31, %v651_v31 }
 0xb3e   : > { %v653_v33 = vsel %vm388_vm14, %v652_v32, 0.0 }
 0xb3f   : > { %654 = vadd.xlane.f32.xlu0 %v653_v33 }
 0xbb2   : > { %v655_v35 = vpop.xlane.xlu0 %654 }
 0xbb3   : > { %v656_v36 = vadd.f32 1e-30, %v655_v35 }
 0xbb5   : > { %1603 = vrsqrt.f32 %v656_v36  ;;  %vm663_vm13 = vweird.f32 %v656_v36 }
 0xbbb   : > { %v1604_v37 = vpop.eup %1603 }
 0xbbc   : > { %v658_v38 = vmul.f32 %v1604_v37, %v656_v36  ;;  %vm664_vm12 = vweird.f32 %v1604_v37 }
 0xbbd   : > { %vm665_vm15 = vmor %vm663_vm13, %vm664_vm12 }
 0xbbe   : > { %v659_v39 = vmul.f32 %v1604_v37, %v658_v38 }
 0xbc0   : > { %v660_v40 = vmul.f32 0.5, %v659_v39 }
 0xbc2   : > { %v661_v41 = vsub.f32 1.5, %v660_v40 }
 0xbc4   : > { %v662_v42 = vmul.f32 %v1604_v37, %v661_v41 }
 0xbc6   : > { %v666_v43 = vsel %vm665_vm15, %v1604_v37, %v662_v42 }
 0xbc7   : > { %v667_v44 = vmul.f32 %v666_v43, %v651_v31 }
 0xbc9   : > { %v669_v46 = vsel %vm406_vm3, %v668_v45, %v667_v44 }
 0xbca   : > { %1515 = vmatmul.msk.f32.vlgmr.msra.gmra.mxu2 %vm271_vm5, %v669_v46 }
 0xbcb   : > { %1212 = vmatpush.msra.mxu2 %v1850_v49 }
 0xc4d   : > { %v690_v47 = vpop.f32.mrf.mxu2 }
 0xc4e   : > { %1516 = vmatmul.msk.f32.vlgmr.msra.gmra.mxu3 %vm271_vm5, %v690_v47 }
 0xc4f   : > { %1235 = vmatpush.msra.mxu3 %v1850_v49 }
 0xcd1   : > { %v713_v48 = vpop.f32.mrf.mxu3 }
 0xcd2   : > { %v716_v50 = vmul.f32 %v713_v48, %v713_v48  ;;  %v760_v49 = vrot.slane %v713_v48, 2  ;;  %v733_v62 = vrot.slane %v713_v48, 1 }
 0xcd4   : > { %v717_v51 = vsel %vm319_vm6, %v716_v50, 0.0 }
 0xcd5   : > { %718 = vadd.xlane.f32.xlu1 %v717_v51 }
 0xd48   : > { %v719_v52 = vpop.xlane.xlu1 %718 }
 0xd49   : > { %v720_v53 = vadd.f32 1e-30, %v719_v52 }
 0xd4b   : > { %1605 = vrsqrt.f32 %v720_v53  ;;  %vm727_vm1 = vweird.f32 %v720_v53 }
 0xd51   : > { %v1606_v54 = vpop.eup %1605 }
 0xd52   : > { %v722_v55 = vmul.f32 %v1606_v54, %v720_v53  ;;  %vm728_vm0 = vweird.f32 %v1606_v54 }
 0xd53   : > { %vm729_vm4 = vmor %vm727_vm1, %vm728_vm0 }
 0xd54   : > { %v723_v56 = vmul.f32 %v1606_v54, %v722_v55 }
 0xd56   : > { %v724_v57 = vmul.f32 0.5, %v723_v56 }
 0xd58   : > { %v725_v58 = vsub.f32 1.5, %v724_v57 }
 0xd5a   : > { %v726_v59 = vmul.f32 %v1606_v54, %v725_v58 }
 0xd5c   : > { %v730_v60 = vsel %vm729_vm4, %v1606_v54, %v726_v59 }
 0xd5d   : > { %v731_v61 = vmul.f32 %v730_v60, %v713_v48 }
 0xd5f   : > { %v762_v63 = vmul.f32 %v760_v49, %v731_v61  ;;  %v735_v0 = vmul.f32 %v733_v62, %v731_v61 }
 0xd61   : > { %v763_v1 = vsel %vm319_vm6, %v762_v63, 0.0  ;;  %v736_v2 = vsel %vm319_vm6, %v735_v0, 0.0 }
 0xd62   : > { %764 = vadd.xlane.f32.xlu1 %v763_v1  ;;  %737 = vadd.xlane.f32.xlu2 %v736_v2 }
 0xdd5   : > { %v738_v3 = vpop.xlane.xlu2 %737  ;;  %v765_v11 = vpop.xlane.xlu1 %764 }
 0xdd6   : > { %v739_v4 = vmul.f32 %v738_v3, %v731_v61  ;;  %v766_v13 = vmul.f32 %v765_v11, %v731_v61 }
 0xdd8   : > { %v741_v5 = vrot.slane %v739_v4, 7  ;;  %v768_v16 = vrot.slane %v766_v13, 6 }
 0xdda   : > { %v743_v6 = vsub.f32 %v713_v48, %v741_v5  ;;  %v770_v19 = vsub.f32 %v713_v48, %v768_v16 }
 0xddc   : > { %v744_v7 = vmul.f32 %v743_v6, %v743_v6  ;;  %v772_v23 = vrot.slane %v770_v19, 1 }
 0xdde   : > { %v745_v8 = vsel %vm348_vm10, %v744_v7, 0.0 }
 0xddf   : > { %746 = vadd.xlane.f32.xlu0 %v745_v8 }
 0xe52   : > { %v747_v9 = vpop.xlane.xlu0 %746 }
 0xe53   : > { %v748_v10 = vadd.f32 1e-30, %v747_v9 }
 0xe55   : > { %1607 = vrsqrt.f32 %v748_v10  ;;  %vm755_vm8 = vweird.f32 %v748_v10 }
 0xe5b   : > { %v1608_v12 = vpop.eup %1607 }
 0xe5c   : > { %v750_v14 = vmul.f32 %v1608_v12, %v748_v10  ;;  %vm756_vm7 = vweird.f32 %v1608_v12 }
 0xe5d   : > { %vm757_vm9 = vmor %vm755_vm8, %vm756_vm7 }
 0xe5e   : > { %v751_v15 = vmul.f32 %v1608_v12, %v750_v14 }
 0xe60   : > { %v752_v17 = vmul.f32 0.5, %v751_v15 }
 0xe62   : > { %v753_v18 = vsub.f32 1.5, %v752_v17 }
 0xe64   : > { %v754_v20 = vmul.f32 %v1608_v12, %v753_v18 }
 0xe66   : > { %v758_v21 = vsel %vm757_vm9, %v1608_v12, %v754_v20 }
 0xe67   : > { %v759_v22 = vmul.f32 %v758_v21, %v743_v6 }
 0xe69   : > { %v774_v24 = vmul.f32 %v772_v23, %v759_v22  ;;  %v799_v43 = vsel %vm404_vm2, %v731_v61, %v759_v22 }
 0xe6b   : > { %v775_v25 = vsel %vm348_vm10, %v774_v24, 0.0 }
 0xe6c   : > { %776 = vadd.xlane.f32.xlu2 %v775_v25 }
 0xedf   : > { %v777_v26 = vpop.xlane.xlu2 %776 }
 0xee0   : > { %v778_v27 = vmul.f32 %v777_v26, %v759_v22 }
 0xee2   : > { %v780_v28 = vrot.slane %v778_v27, 7 }
 0xee4   : > { %v782_v29 = vsub.f32 %v770_v19, %v780_v28 }
 0xee6   : > { %v783_v30 = vmul.f32 %v782_v29, %v782_v29 }
 0xee8   : > { %v784_v31 = vsel %vm388_vm14, %v783_v30, 0.0 }
 0xee9   : > { %785 = vadd.xlane.f32.xlu0 %v784_v31 }
 0xf5c   : > { %v786_v32 = vpop.xlane.xlu0 %785 }
 0xf5d   : > { %v787_v33 = vadd.f32 1e-30, %v786_v32 }
 0xf5f   : > { %1609 = vrsqrt.f32 %v787_v33  ;;  %vm794_vm12 = vweird.f32 %v787_v33 }
 0xf65   : > { %v1610_v35 = vpop.eup %1609 }
 0xf66   : > { %v789_v36 = vmul.f32 %v1610_v35, %v787_v33  ;;  %vm795_vm11 = vweird.f32 %v1610_v35 }
 0xf67   : > { %vm796_vm13 = vmor %vm794_vm12, %vm795_vm11 }
 0xf68   : > { %v790_v37 = vmul.f32 %v1610_v35, %v789_v36 }
 0xf6a   : > { %v791_v38 = vmul.f32 0.5, %v790_v37 }
 0xf6c   : > { %v792_v39 = vsub.f32 1.5, %v791_v38 }
 0xf6e   : > { %v793_v40 = vmul.f32 %v1610_v35, %v792_v39 }
 0xf70   : > { %v797_v41 = vsel %vm796_vm13, %v1610_v35, %v793_v40 }
 0xf71   : > { %v798_v42 = vmul.f32 %v797_v41, %v782_v29 }
 0xf73   : > { %v800_v44 = vsel %vm406_vm3, %v799_v43, %v798_v42 }
 0xf74   : > { %1517 = vmatmul.msk.f32.vlgmr.msra.gmra.mxu0 %vm271_vm5, %v800_v44 }
 0xff1   : > { %v821_v45 = vpop.f32.mrf.mxu0 }
 0xff2   : > { %1518 = vmatmul.msk.f32.vlgmr.msra.gmra.mxu1 %vm271_vm5, %v821_v45 }
0x106f   : > { %v844_v46 = vpop.f32.mrf.mxu1 }
0x1070   : > { %v847_v47 = vmul.f32 %v844_v46, %v844_v46  ;;  %v891_v60 = vrot.slane %v844_v46, 2  ;;  %v864_v61 = vrot.slane %v844_v46, 1 }
0x1072   : > { %v848_v48 = vsel %vm319_vm6, %v847_v47, 0.0 }
0x1073   : > { %849 = vadd.xlane.f32.xlu1 %v848_v48 }
0x10e6   : > { %v850_v50 = vpop.xlane.xlu1 %849 }
0x10e7   : > { %v851_v51 = vadd.f32 1e-30, %v850_v50 }
0x10e9   : > { %1611 = vrsqrt.f32 %v851_v51  ;;  %vm858_vm0 = vweird.f32 %v851_v51 }
0x10ef   : > { %v1612_v52 = vpop.eup %1611 }
0x10f0   : > { %v853_v53 = vmul.f32 %v1612_v52, %v851_v51  ;;  %vm859_vm15 = vweird.f32 %v1612_v52 }
0x10f1   : > { %vm860_vm1 = vmor %vm858_vm0, %vm859_vm15 }
0x10f2   : > { %v854_v54 = vmul.f32 %v1612_v52, %v853_v53 }
0x10f4   : > { %v855_v55 = vmul.f32 0.5, %v854_v54 }
0x10f6   : > { %v856_v56 = vsub.f32 1.5, %v855_v55 }
0x10f8   : > { %v857_v57 = vmul.f32 %v1612_v52, %v856_v56 }
0x10fa   : > { %v861_v58 = vsel %vm860_vm1, %v1612_v52, %v857_v57 }
0x10fb   : > { %v862_v59 = vmul.f32 %v861_v58, %v844_v46 }
0x10fd   : > { %v893_v49 = vmul.f32 %v891_v60, %v862_v59  ;;  %v866_v62 = vmul.f32 %v864_v61, %v862_v59 }
0x10ff   : > { %v894_v63 = vsel %vm319_vm6, %v893_v49, 0.0  ;;  %v867_v0 = vsel %vm319_vm6, %v866_v62, 0.0 }
0x1100   : > { %895 = vadd.xlane.f32.xlu1 %v894_v63  ;;  %868 = vadd.xlane.f32.xlu2 %v867_v0 }
0x1173   : > { %v869_v1 = vpop.xlane.xlu2 %868  ;;  %v896_v9 = vpop.xlane.xlu1 %895 }
0x1174   : > { %v870_v2 = vmul.f32 %v869_v1, %v862_v59  ;;  %v897_v11 = vmul.f32 %v896_v9, %v862_v59 }
0x1176   : > { %v872_v3 = vrot.slane %v870_v2, 7  ;;  %v899_v14 = vrot.slane %v897_v11, 6 }
0x1178   : > { %v874_v4 = vsub.f32 %v844_v46, %v872_v3  ;;  %v901_v17 = vsub.f32 %v844_v46, %v899_v14 }
0x117a   : > { %v875_v5 = vmul.f32 %v874_v4, %v874_v4  ;;  %v903_v21 = vrot.slane %v901_v17, 1 }
0x117c   : > { %v876_v6 = vsel %vm348_vm10, %v875_v5, 0.0 }
0x117d   : > { %877 = vadd.xlane.f32.xlu0 %v876_v6 }
0x11f0   : > { %v878_v7 = vpop.xlane.xlu0 %877 }
0x11f1   : > { %v879_v8 = vadd.f32 1e-30, %v878_v7 }
0x11f3   : > { %1613 = vrsqrt.f32 %v879_v8  ;;  %vm886_vm7 = vweird.f32 %v879_v8 }
0x11f9   : > { %v1614_v10 = vpop.eup %1613 }
0x11fa   : > { %v881_v12 = vmul.f32 %v1614_v10, %v879_v8  ;;  %vm887_vm4 = vweird.f32 %v1614_v10 }
0x11fb   : > { %vm888_vm8 = vmor %vm886_vm7, %vm887_vm4 }
0x11fc   : > { %v882_v13 = vmul.f32 %v1614_v10, %v881_v12 }
0x11fe   : > { %v883_v15 = vmul.f32 0.5, %v882_v13 }
0x1200   : > { %v884_v16 = vsub.f32 1.5, %v883_v15 }
0x1202   : > { %v885_v18 = vmul.f32 %v1614_v10, %v884_v16 }
0x1204   : > { %v889_v19 = vsel %vm888_vm8, %v1614_v10, %v885_v18 }
0x1205   : > { %v890_v20 = vmul.f32 %v889_v19, %v874_v4 }
0x1207   : > { %v905_v22 = vmul.f32 %v903_v21, %v890_v20  ;;  %v930_v41 = vsel %vm404_vm2, %v862_v59, %v890_v20 }
0x1209   : > { %v906_v23 = vsel %vm348_vm10, %v905_v22, 0.0 }
0x120a   : > { %907 = vadd.xlane.f32.xlu2 %v906_v23 }
0x127d   : > { %v908_v24 = vpop.xlane.xlu2 %907 }
0x127e   : > { %v909_v25 = vmul.f32 %v908_v24, %v890_v20 }
0x1280   : > { %v911_v26 = vrot.slane %v909_v25, 7 }
0x1282   : > { %v913_v27 = vsub.f32 %v901_v17, %v911_v26 }
0x1284   : > { %v914_v28 = vmul.f32 %v913_v27, %v913_v27 }
0x1286   : > { %v915_v29 = vsel %vm388_vm14, %v914_v28, 0.0 }
0x1287   : > { %916 = vadd.xlane.f32.xlu0 %v915_v29 }
0x12fa   : > { %v917_v30 = vpop.xlane.xlu0 %916 }
0x12fb   : > { %v918_v31 = vadd.f32 1e-30, %v917_v30 }
0x12fd   : > { %1615 = vrsqrt.f32 %v918_v31  ;;  %vm925_vm11 = vweird.f32 %v918_v31 }
0x1303   : > { %v1616_v32 = vpop.eup %1615 }
0x1304   : > { %v920_v33 = vmul.f32 %v1616_v32, %v918_v31  ;;  %vm926_vm9 = vweird.f32 %v1616_v32 }
0x1305   : > { %vm927_vm12 = vmor %vm925_vm11, %vm926_vm9 }
0x1306   : > { %v921_v35 = vmul.f32 %v1616_v32, %v920_v33 }
0x1308   : > { %v922_v36 = vmul.f32 0.5, %v921_v35 }
0x130a   : > { %v923_v37 = vsub.f32 1.5, %v922_v36 }
0x130c   : > { %v924_v38 = vmul.f32 %v1616_v32, %v923_v37 }
0x130e   : > { %v928_v39 = vsel %vm927_vm12, %v1616_v32, %v924_v38 }
0x130f   : > { %v929_v40 = vmul.f32 %v928_v39, %v913_v27 }
0x1311   : > { %v931_v42 = vsel %vm406_vm3, %v930_v41, %v929_v40 }
0x1312   : > { %1519 = vmatmul.msk.f32.vlgmr.msrb.gmra.mxu2 %vm271_vm5, %v931_v42 }
0x1395   : > { %v952_v43 = vpop.f32.mrf.mxu2 }
0x1396   : > { %1520 = vmatmul.msk.f32.vlgmr.msrb.gmra.mxu3 %vm271_vm5, %v952_v43 }
0x1419   : > { %v975_v44 = vpop.f32.mrf.mxu3 }
0x141a   : > { %v978_v45 = vmul.f32 %v975_v44, %v975_v44  ;;  %v1022_v58 = vrot.slane %v975_v44, 2  ;;  %v995_v59 = vrot.slane %v975_v44, 1 }
0x141c   : > { %v979_v46 = vsel %vm319_vm6, %v978_v45, 0.0 }
0x141d   : > { %980 = vadd.xlane.f32.xlu1 %v979_v46 }
0x1490   : > { %v981_v47 = vpop.xlane.xlu1 %980 }
0x1491   : > { %v982_v48 = vadd.f32 1e-30, %v981_v47 }
0x1493   : > { %1617 = vrsqrt.f32 %v982_v48  ;;  %vm989_vm15 = vweird.f32 %v982_v48 }
0x1499   : > { %v1618_v50 = vpop.eup %1617 }
0x149a   : > { %v984_v51 = vmul.f32 %v1618_v50, %v982_v48  ;;  %vm990_vm13 = vweird.f32 %v1618_v50 }
0x149b   : > { %vm991_vm0 = vmor %vm989_vm15, %vm990_vm13 }
0x149c   : > { %v985_v52 = vmul.f32 %v1618_v50, %v984_v51 }
0x149e   : > { %v986_v53 = vmul.f32 0.5, %v985_v52 }
0x14a0   : > { %v987_v54 = vsub.f32 1.5, %v986_v53 }
0x14a2   : > { %v988_v55 = vmul.f32 %v1618_v50, %v987_v54 }
0x14a4   : > { %v992_v56 = vsel %vm991_vm0, %v1618_v50, %v988_v55 }
0x14a5   : > { %v993_v57 = vmul.f32 %v992_v56, %v975_v44 }
0x14a7   : > { %v1024_v60 = vmul.f32 %v1022_v58, %v993_v57  ;;  %v997_v61 = vmul.f32 %v995_v59, %v993_v57 }
0x14a9   : > { %v1025_v49 = vsel %vm319_vm6, %v1024_v60, 0.0  ;;  %v998_v62 = vsel %vm319_vm6, %v997_v61, 0.0 }
0x14aa   : > { %1026 = vadd.xlane.f32.xlu1 %v1025_v49  ;;  %999 = vadd.xlane.f32.xlu2 %v998_v62 }
0x151d   : > { %v1000_v63 = vpop.xlane.xlu2 %999  ;;  %v1027_v7 = vpop.xlane.xlu1 %1026 }
0x151e   : > { %v1001_v0 = vmul.f32 %v1000_v63, %v993_v57  ;;  %v1028_v9 = vmul.f32 %v1027_v7, %v993_v57 }
0x1520   : > { %v1003_v1 = vrot.slane %v1001_v0, 7  ;;  %v1030_v12 = vrot.slane %v1028_v9, 6 }
0x1522   : > { %v1005_v2 = vsub.f32 %v975_v44, %v1003_v1  ;;  %v1032_v15 = vsub.f32 %v975_v44, %v1030_v12 }
0x1524   : > { %v1006_v3 = vmul.f32 %v1005_v2, %v1005_v2  ;;  %v1034_v19 = vrot.slane %v1032_v15, 1 }
0x1526   : > { %v1007_v4 = vsel %vm348_vm10, %v1006_v3, 0.0 }
0x1527   : > { %1008 = vadd.xlane.f32.xlu0 %v1007_v4 }
0x159a   : > { %v1009_v5 = vpop.xlane.xlu0 %1008 }
0x159b   : > { %v1010_v6 = vadd.f32 1e-30, %v1009_v5 }
0x159d   : > { %1619 = vrsqrt.f32 %v1010_v6  ;;  %vm1017_vm4 = vweird.f32 %v1010_v6 }
0x15a3   : > { %v1620_v8 = vpop.eup %1619 }
0x15a4   : > { %v1012_v10 = vmul.f32 %v1620_v8, %v1010_v6  ;;  %vm1018_vm1 = vweird.f32 %v1620_v8 }
0x15a5   : > { %vm1019_vm7 = vmor %vm1017_vm4, %vm1018_vm1 }
0x15a6   : > { %v1013_v11 = vmul.f32 %v1620_v8, %v1012_v10 }
0x15a8   : > { %v1014_v13 = vmul.f32 0.5, %v1013_v11 }
0x15aa   : > { %v1015_v14 = vsub.f32 1.5, %v1014_v13 }
0x15ac   : > { %v1016_v16 = vmul.f32 %v1620_v8, %v1015_v14 }
0x15ae   : > { %v1020_v17 = vsel %vm1019_vm7, %v1620_v8, %v1016_v16 }
0x15af   : > { %v1021_v18 = vmul.f32 %v1020_v17, %v1005_v2 }
0x15b1   : > { %v1036_v20 = vmul.f32 %v1034_v19, %v1021_v18  ;;  %v1061_v39 = vsel %vm404_vm2, %v993_v57, %v1021_v18 }
0x15b3   : > { %v1037_v21 = vsel %vm348_vm10, %v1036_v20, 0.0 }
0x15b4   : > { %1038 = vadd.xlane.f32.xlu2 %v1037_v21 }
0x1627   : > { %v1039_v22 = vpop.xlane.xlu2 %1038 }
0x1628   : > { %v1040_v23 = vmul.f32 %v1039_v22, %v1021_v18 }
0x162a   : > { %v1042_v24 = vrot.slane %v1040_v23, 7 }
0x162c   : > { %v1044_v25 = vsub.f32 %v1032_v15, %v1042_v24 }
0x162e   : > { %v1045_v26 = vmul.f32 %v1044_v25, %v1044_v25 }
0x1630   : > { %v1046_v27 = vsel %vm388_vm14, %v1045_v26, 0.0 }
0x1631   : > { %1047 = vadd.xlane.f32.xlu0 %v1046_v27 }
0x16a4   : > { %v1048_v28 = vpop.xlane.xlu0 %1047 }
0x16a5   : > { %v1049_v29 = vadd.f32 1e-30, %v1048_v28 }
0x16a7   : > { %1621 = vrsqrt.f32 %v1049_v29  ;;  %vm1056_vm9 = vweird.f32 %v1049_v29 }
0x16ad   : > { %v1622_v30 = vpop.eup %1621 }
0x16ae   : > { %v1051_v31 = vmul.f32 %v1622_v30, %v1049_v29  ;;  %vm1057_vm8 = vweird.f32 %v1622_v30 }
0x16af   : > { %vm1058_vm11 = vmor %vm1056_vm9, %vm1057_vm8 }
0x16b0   : > { %v1052_v32 = vmul.f32 %v1622_v30, %v1051_v31 }
0x16b2   : > { %v1053_v33 = vmul.f32 0.5, %v1052_v32 }
0x16b4   : > { %v1054_v35 = vsub.f32 1.5, %v1053_v33 }
0x16b6   : > { %v1055_v36 = vmul.f32 %v1622_v30, %v1054_v35 }
0x16b8   : > { %v1059_v37 = vsel %vm1058_vm11, %v1622_v30, %v1055_v36 }
0x16b9   : > { %v1060_v38 = vmul.f32 %v1059_v37, %v1044_v25 }
0x16bb   : > { %v1062_v40 = vsel %vm406_vm3, %v1061_v39, %v1060_v38 }
0x16bc   : > { %1521 = vmatmul.msk.f32.vlgmr.msrb.gmra.mxu0 %vm271_vm5, %v1062_v40 }
0x1739   : > { %v1083_v41 = vpop.f32.mrf.mxu0 }
0x173a   : > { %1522 = vmatmul.msk.f32.vlgmr.msrb.gmra.mxu1 %vm271_vm5, %v1083_v41 }
0x17b7   : > { %v1106_v42 = vpop.f32.mrf.mxu1 }
0x17b8   : > { %v1109_v43 = vmul.f32 %v1106_v42, %v1106_v42  ;;  %v1153_v56 = vrot.slane %v1106_v42, 2  ;;  %v1126_v57 = vrot.slane %v1106_v42, 1 }
0x17ba   : > { %v1110_v44 = vsel %vm319_vm6, %v1109_v43, 0.0 }
0x17bb   : > { %1111 = vadd.xlane.f32.xlu1 %v1110_v44 }
0x182e   : > { %v1112_v45 = vpop.xlane.xlu1 %1111 }
0x182f   : > { %v1113_v46 = vadd.f32 1e-30, %v1112_v45 }
0x1831   : > { %1623 = vrsqrt.f32 %v1113_v46  ;;  %vm1120_vm13 = vweird.f32 %v1113_v46 }
0x1837   : > { %v1624_v47 = vpop.eup %1623 }
0x1838   : > { %v1115_v48 = vmul.f32 %v1624_v47, %v1113_v46  ;;  %vm1121_vm12 = vweird.f32 %v1624_v47 }
0x1839   : > { %vm1122_vm15 = vmor %vm1120_vm13, %vm1121_vm12 }
0x183a   : > { %v1116_v50 = vmul.f32 %v1624_v47, %v1115_v48 }
0x183c   : > { %v1117_v51 = vmul.f32 0.5, %v1116_v50 }
0x183e   : > { %v1118_v52 = vsub.f32 1.5, %v1117_v51 }
0x1840   : > { %v1119_v53 = vmul.f32 %v1624_v47, %v1118_v52 }
0x1842   : > { %v1123_v54 = vsel %vm1122_vm15, %v1624_v47, %v1119_v53 }
0x1843   : > { %v1124_v55 = vmul.f32 %v1123_v54, %v1106_v42 }
0x1845   : > { %v1155_v58 = vmul.f32 %v1153_v56, %v1124_v55  ;;  %v1128_v59 = vmul.f32 %v1126_v57, %v1124_v55 }
0x1847   : > { %v1156_v60 = vsel %vm319_vm6, %v1155_v58, 0.0  ;;  %v1129_v61 = vsel %vm319_vm6, %v1128_v59, 0.0 }
0x1848   : > { %1157 = vadd.xlane.f32.xlu1 %v1156_v60  ;;  %1130 = vadd.xlane.f32.xlu2 %v1129_v61 }
0x18bb   : > { %v1131_v49 = vpop.xlane.xlu2 %1130  ;;  %v1158_v5 = vpop.xlane.xlu1 %1157 }
0x18bc   : > { %v1132_v62 = vmul.f32 %v1131_v49, %v1124_v55  ;;  %v1159_v7 = vmul.f32 %v1158_v5, %v1124_v55 }
0x18be   : > { %v1134_v63 = vrot.slane %v1132_v62, 7  ;;  %v1161_v10 = vrot.slane %v1159_v7, 6 }
0x18c0   : > { %v1136_v0 = vsub.f32 %v1106_v42, %v1134_v63  ;;  %v1163_v13 = vsub.f32 %v1106_v42, %v1161_v10 }
0x18c2   : > { %v1137_v1 = vmul.f32 %v1136_v0, %v1136_v0  ;;  %v1165_v17 = vrot.slane %v1163_v13, 1 }
0x18c4   : > { %v1138_v2 = vsel %vm348_vm10, %v1137_v1, 0.0 }
0x18c5   : > { %1139 = vadd.xlane.f32.xlu0 %v1138_v2 }
0x1938   : > { %v1140_v3 = vpop.xlane.xlu0 %1139 }
0x1939   : > { %v1141_v4 = vadd.f32 1e-30, %v1140_v3 }
0x193b   : > { %1625 = vrsqrt.f32 %v1141_v4  ;;  %vm1148_vm1 = vweird.f32 %v1141_v4 }
0x1941   : > { %v1626_v6 = vpop.eup %1625 }
0x1942   : > { %v1143_v8 = vmul.f32 %v1626_v6, %v1141_v4  ;;  %vm1149_vm0 = vweird.f32 %v1626_v6 }
0x1943   : > { %vm1150_vm4 = vmor %vm1148_vm1, %vm1149_vm0 }
0x1944   : > { %v1144_v9 = vmul.f32 %v1626_v6, %v1143_v8 }
0x1946   : > { %v1145_v11 = vmul.f32 0.5, %v1144_v9 }
0x1948   : > { %v1146_v12 = vsub.f32 1.5, %v1145_v11 }
0x194a   : > { %v1147_v14 = vmul.f32 %v1626_v6, %v1146_v12 }
0x194c   : > { %v1151_v15 = vsel %vm1150_vm4, %v1626_v6, %v1147_v14 }
0x194d   : > { %v1152_v16 = vmul.f32 %v1151_v15, %v1136_v0 }
0x194f   : > { %v1167_v18 = vmul.f32 %v1165_v17, %v1152_v16  ;;  %v1192_v37 = vsel %vm404_vm2, %v1124_v55, %v1152_v16 }
0x1951   : > { %v1168_v19 = vsel %vm348_vm10, %v1167_v18, 0.0 }
0x1952   : > { %1169 = vadd.xlane.f32.xlu2 %v1168_v19 }
0x19c5   : > { %v1170_v20 = vpop.xlane.xlu2 %1169 }
0x19c6   : > { %v1171_v21 = vmul.f32 %v1170_v20, %v1152_v16 }
0x19c8   : > { %v1173_v22 = vrot.slane %v1171_v21, 7 }
0x19ca   : > { %v1175_v23 = vsub.f32 %v1163_v13, %v1173_v22 }
0x19cc   : > { %v1176_v24 = vmul.f32 %v1175_v23, %v1175_v23 }
0x19ce   : > { %v1177_v25 = vsel %vm388_vm14, %v1176_v24, 0.0 }
0x19cf   : > { %1178 = vadd.xlane.f32.xlu0 %v1177_v25 }
0x1a42   : > { %v1179_v26 = vpop.xlane.xlu0 %1178 }
0x1a43   : > { %v1180_v27 = vadd.f32 1e-30, %v1179_v26 }
0x1a45   : > { %1627 = vrsqrt.f32 %v1180_v27  ;;  %vm1187_vm8 = vweird.f32 %v1180_v27 }
0x1a4b   : > { %v1628_v28 = vpop.eup %1627 }
0x1a4c   : > { %v1182_v29 = vmul.f32 %v1628_v28, %v1180_v27  ;;  %vm1188_vm7 = vweird.f32 %v1628_v28 }
0x1a4d   : > { %vm1189_vm9 = vmor %vm1187_vm8, %vm1188_vm7 }
0x1a4e   : > { %v1183_v30 = vmul.f32 %v1628_v28, %v1182_v29 }
0x1a50   : > { %v1184_v31 = vmul.f32 0.5, %v1183_v30 }
0x1a52   : > { %v1185_v32 = vsub.f32 1.5, %v1184_v31 }
0x1a54   : > { %v1186_v33 = vmul.f32 %v1628_v28, %v1185_v32 }
0x1a56   : > { %v1190_v35 = vsel %vm1189_vm9, %v1628_v28, %v1186_v33 }
0x1a57   : > { %v1191_v36 = vmul.f32 %v1190_v35, %v1175_v23 }
0x1a59   : > { %v1193_v38 = vsel %vm406_vm3, %v1192_v37, %v1191_v36 }
0x1a5a   : > { %1523 = vmatmul.msk.f32.vlgmr.msra.gmra.mxu2 %vm271_vm5, %v1193_v38 }
0x1add   : > { %v1214_v39 = vpop.f32.mrf.mxu2 }
0x1ade   : > { %1524 = vmatmul.msk.f32.vlgmr.msra.gmra.mxu3 %vm271_vm5, %v1214_v39  ;;  %v1364_v39 = vlaneseq }
0x1b61   : > { %v1237_v40 = vpop.f32.mrf.mxu3 }
0x1b62   : > { %v1240_v41 = vmul.f32 %v1237_v40, %v1237_v40  ;;  %v1284_v54 = vrot.slane %v1237_v40, 2  ;;  %v1257_v55 = vrot.slane %v1237_v40, 1 }
0x1b64   : > { %v1241_v42 = vsel %vm319_vm6, %v1240_v41, 0.0 }
0x1b65   : > { %1242 = vadd.xlane.f32.xlu1 %v1241_v42 }
0x1bd8   : > { %v1948_v43 = vpop.xlane.xlu1 %1242 }
0x1bd9   : > { %v1244_v44 = vadd.f32 1e-30, %v1948_v43 }
0x1bdb   : > { %1629 = vrsqrt.f32 %v1244_v44  ;;  %vm1251_vm12 = vweird.f32 %v1244_v44 }
0x1be1   : > { %v1630_v45 = vpop.eup %1629 }
0x1be2   : > { %v1246_v46 = vmul.f32 %v1630_v45, %v1244_v44  ;;  %vm1252_vm11 = vweird.f32 %v1630_v45 }
0x1be3   : > { %vm1253_vm13 = vmor %vm1251_vm12, %vm1252_vm11  ;;  %vm1395_vm12 = vcmask 2048  }
0x1be4   : > { %v1247_v47 = vmul.f32 %v1630_v45, %v1246_v46 }
0x1be6   : > { %v1248_v48 = vmul.f32 0.5, %v1247_v47 }
0x1be8   : > { %v1249_v50 = vsub.f32 1.5, %v1248_v48 }
0x1bea   : > { %v1250_v51 = vmul.f32 %v1630_v45, %v1249_v50 }
0x1bec   : > { %v1254_v52 = vsel %vm1253_vm13, %v1630_v45, %v1250_v51 }
0x1bed   : > { %v1255_v53 = vmul.f32 %v1254_v52, %v1237_v40 }
0x1bef   : > { %v1286_v56 = vmul.f32 %v1284_v54, %v1255_v53  ;;  %v1259_v57 = vmul.f32 %v1257_v55, %v1255_v53 }
0x1bf1   : > { %v1287_v58 = vsel %vm319_vm6, %v1286_v56, 0.0  ;;  %v1260_v59 = vsel %vm319_vm6, %v1259_v57, 0.0 }
0x1bf2   : > { %1288 = vadd.xlane.f32.xlu1 %v1287_v58  ;;  %1261 = vadd.xlane.f32.xlu2 %v1260_v59 }
0x1c65   : > { %v1262_v60 = vpop.xlane.xlu2 %1261  ;;  %v1289_v3 = vpop.xlane.xlu1 %1288 }
0x1c66   : > { %v1263_v61 = vmul.f32 %v1262_v60, %v1255_v53  ;;  %v1290_v5 = vmul.f32 %v1289_v3, %v1255_v53 }
0x1c68   : > { %v1265_v49 = vrot.slane %v1263_v61, 7  ;;  %v1292_v8 = vrot.slane %v1290_v5, 6 }
0x1c6a   : > { %v1267_v62 = vsub.f32 %v1237_v40, %v1265_v49  ;;  %v1294_v11 = vsub.f32 %v1237_v40, %v1292_v8  ;;  %v1365_v40 = vand.u32 127, %v1364_v39 }
0x1c6c   : > { %v1268_v63 = vmul.f32 %v1267_v62, %v1267_v62  ;;  %v1296_v15 = vrot.slane %v1294_v11, 1 }
0x1c6e   : > { %v1269_v0 = vsel %vm348_vm10, %v1268_v63, 0.0 }
0x1c6f   : > { %1270 = vadd.xlane.f32.xlu0 %v1269_v0 }
0x1ce2   : > { %v1954_v1 = vpop.xlane.xlu0 %1270 }
0x1ce3   : > { %v1272_v2 = vadd.f32 1e-30, %v1954_v1  ;;  %v1325_v52 = vsel %vm404_vm2, %v1948_v43, %v1954_v1 }
0x1ce5   : > { %1631 = vrsqrt.f32 %v1272_v2  ;;  %vm1279_vm6 = vweird.f32 %v1272_v2 }
0x1ceb   : > { %v1632_v4 = vpop.eup %1631 }
0x1cec   : > { %v1274_v6 = vmul.f32 %v1632_v4, %v1272_v2  ;;  %vm1280_vm5 = vweird.f32 %v1632_v4 }
0x1ced   : > { %vm1281_vm15 = vmor %vm1279_vm6, %vm1280_vm5 }
0x1cee   : > { %v1275_v7 = vmul.f32 %v1632_v4, %v1274_v6 }
0x1cf0   : > { %v1276_v9 = vmul.f32 0.5, %v1275_v7 }
0x1cf2   : > { %v1277_v10 = vsub.f32 1.5, %v1276_v9 }
0x1cf4   : > { %v1278_v12 = vmul.f32 %v1632_v4, %v1277_v10 }
0x1cf6   : > { %v1282_v13 = vsel %vm1281_vm15, %v1632_v4, %v1278_v12 }
0x1cf7   : > { %v1283_v14 = vmul.f32 %v1282_v13, %v1267_v62 }
0x1cf9   : > { %v1298_v16 = vmul.f32 %v1296_v15, %v1283_v14  ;;  %v1323_v35 = vsel %vm404_vm2, %v1255_v53, %v1283_v14 }
0x1cfb   : > { %v1299_v17 = vsel %vm348_vm10, %v1298_v16, 0.0 }
0x1cfc   : > { %1300 = vadd.xlane.f32.xlu2 %v1299_v17 }
0x1d6f   : > { %v1301_v18 = vpop.xlane.xlu2 %1300 }
0x1d70   : > { %v1302_v19 = vmul.f32 %v1301_v18, %v1283_v14 }
0x1d72   : > { %v1304_v20 = vrot.slane %v1302_v19, 7 }
0x1d74   : > { %v1306_v21 = vsub.f32 %v1294_v11, %v1304_v20 }
0x1d76   : > { %v1307_v22 = vmul.f32 %v1306_v21, %v1306_v21 }
0x1d78   : > { %v1308_v23 = vsel %vm388_vm14, %v1307_v22, 0.0  ;;  %vm1367_vm14 = vcmask 59392  }
0x1d79   : > { %1309 = vadd.xlane.f32.xlu0 %v1308_v23 }
0x1dec   : > { %v1310_v24 = vpop.xlane.xlu0 %1309 }
0x1ded   : > { %v1311_v25 = vadd.f32 1e-30, %v1310_v24  ;;  %v1326_v53 = vsel %vm406_vm3, %v1325_v52, %v1310_v24 }
0x1dee   : > { %vm1334_vm2 = vcmp.eq.f32.partialorder %v1326_v53, inf  ;;  %v1337_v3 = vand.u32 2147483648, %v1326_v53 }
0x1def   : > { %1633 = vrsqrt.f32 %v1311_v25  ;;  %vm1318_vm10 = vweird.f32 %v1311_v25 }
0x1df0   : > { %1635 = vrsqrt.f32 %v1326_v53 }
0x1df5   : > { %v1634_v26 = vpop.eup %1633 }
0x1df6   : > { %v1313_v27 = vmul.f32 %v1634_v26, %v1311_v25  ;;  %vm1319_vm0 = vweird.f32 %v1634_v26  ;;  %v1636_v54 = vpop.eup %1635  ;;  %v1745_v25 = vmov 0  }
0x1df7   : > { %vm1320_vm1 = vmor %vm1318_vm10, %vm1319_vm0  ;;  %v1328_v55 = vmul.f32 %v1636_v54, %v1326_v53  ;;  %1581 = vset.pattern.permute.xlu2 %v1745_v25  ;;  %1582 = vset.pattern.permute.xlu0 %v1745_v25 }
0x1df8   : > { %v1314_v28 = vmul.f32 %v1634_v26, %v1313_v27 }
0x1df9   : > { %v1329_v57 = vmul.f32 %v1636_v54, %v1328_v55 }
0x1dfa   : > { %v1315_v29 = vmul.f32 0.5, %v1314_v28 }
0x1dfb   : > { %v1330_v61 = vmul.f32 0.5, %v1329_v57 }
0x1dfc   : > { %v1316_v30 = vsub.f32 1.5, %v1315_v29 }
0x1dfd   : > { %v1331_v62 = vsub.f32 1.5, %v1330_v61 }
0x1dfe   : > { %v1317_v31 = vmul.f32 %v1634_v26, %v1316_v30 }
0x1dff   : > { %v1332_v43 = vmul.f32 %v1636_v54, %v1331_v62 }
0x1e00   : > { %v1321_v32 = vsel %vm1320_vm1, %v1634_v26, %v1317_v31 }
0x1e01   : > { %v1322_v33 = vmul.f32 %v1321_v32, %v1306_v21  ;;  %v1333_v1 = vmul.f32 %v1332_v43, %v1326_v53 }
0x1e03   : > { %v1961_v36 = vsel %vm406_vm3, %v1323_v35, %v1322_v33  ;;  %v1335_v2 = vsel %vm1334_vm2, %v1326_v53, %v1333_v1  ;;  %vm1336_vm3 = vcmp.eq.f32.partialorder %v1326_v53, 0.0 }
0x1e04   : > { %v1366_v37 = vand.u32 2147483647, %v1961_v36  ;;  %v1338_v4 = vsel %vm1336_vm3, %v1337_v3, %v1335_v2 }
0x1e05   : > { %1637 = vrsqrt.f32 %v1338_v4  ;;  %vm1346_vm9 = vcmp.eq.f32.partialorder %v1338_v4, inf  ;;  %v1349_v13 = vand.u32 2147483648, %v1338_v4  ;;  %vm1348_vm11 = vcmp.eq.f32.partialorder %v1338_v4, 0.0 }
0x1e06   : > { %v1368_v38 = vsel %vm1367_vm14, %v1366_v37, -inf }
0x1e07   : > { %1369 = vmax.xlane.f32.xlu1 %v1368_v38 }
0x1e0b   : > { %v1638_v5 = vpop.eup %1637 }
0x1e0c   : > { %v1340_v6 = vmul.f32 %v1638_v5, %v1338_v4 }
0x1e0e   : > { %v1341_v7 = vmul.f32 %v1638_v5, %v1340_v6 }
0x1e10   : > { %v1342_v8 = vmul.f32 0.5, %v1341_v7 }
0x1e12   : > { %v1343_v9 = vsub.f32 1.5, %v1342_v8 }
0x1e14   : > { %v1344_v10 = vmul.f32 %v1638_v5, %v1343_v9 }
0x1e16   : > { %v1345_v11 = vmul.f32 %v1344_v10, %v1338_v4 }
0x1e18   : > { %v1347_v12 = vsel %vm1346_vm9, %v1338_v4, %v1345_v11 }
0x1e19   : > { %v1350_v14 = vsel %vm1348_vm11, %v1349_v13, %v1347_v12 }
0x1e1a   : > { %v1351_v15 = vmul.f32 %v1350_v14, %v1847_v34 }
0x1e1c   : > { %v1396_v16 = vsel %vm1395_vm12, %v1351_v15, 0.0  ;;  %1639 = vrsqrt.f32 %v1351_v15  ;;  %vm1359_vm13 = vcmp.eq.f32.partialorder %v1351_v15, inf  ;;  %vm1361_vm6 = vcmp.eq.f32.partialorder %v1351_v15, 0.0 }
0x1e1d   : > { %v1397_v17 = vrot.slane %v1396_v16, 4 }
0x1e1f   : > { %v1398_v18 = vadd.f32 %v1397_v17, %v1396_v16 }
0x1e21   : > { %v1399_v19 = vrot.slane %v1398_v18, 2 }
0x1e22   : > { %v1640_v24 = vpop.eup %1639 }
0x1e23   : > { %v1400_v20 = vadd.f32 %v1399_v19, %v1398_v18  ;;  %v1353_v26 = vmul.f32 %v1640_v24, %v1351_v15 }
0x1e25   : > { %v1401_v21 = vrot.slane %v1400_v20, 1  ;;  %v1354_v27 = vmul.f32 %v1640_v24, %v1353_v26 }
0x1e27   : > { %v1402_v22 = vadd.f32 %v1401_v21, %v1400_v20  ;;  %v1355_v29 = vmul.f32 0.5, %v1354_v27 }
0x1e29   : > { %v1403_v23 = vmax.f32 %v1402_v22, 1e-24  ;;  %v1356_v30 = vsub.f32 1.5, %v1355_v29 }
0x1e2b   : > { %1641 = vrsqrt.f32 %v1403_v23  ;;  %v1357_v32 = vmul.f32 %v1640_v24, %v1356_v30  ;;  %vm1410_vm0 = vweird.f32 %v1403_v23 }
0x1e2d   : > { %v1358_v35 = vmul.f32 %v1357_v32, %v1351_v15 }
0x1e2f   : > { %v1360_v38 = vsel %vm1359_vm13, %v1351_v15, %v1358_v35 }
0x1e31   : > { %v1642_v28 = vpop.eup %1641 }
0x1e32   : > { %v1405_v34 = vmul.f32 %v1642_v28, %v1403_v23  ;;  %vm1411_vm5 = vweird.f32 %v1642_v28 }
0x1e33   : > { %vm1412_vm10 = vmor %vm1410_vm0, %vm1411_vm5 }
0x1e34   : > { %v1406_v31 = vmul.f32 %v1642_v28, %v1405_v34 }
0x1e36   : > { %v1407_v33 = vmul.f32 0.5, %v1406_v31 }
0x1e7a   : > { %v1370_v41 = vpop.xlane.xlu1 %1369 }
0x1e7b   : > { %vm1371_vm4 = vcmp.ge.f32.partialorder %v1366_v37, %v1370_v41  ;;  %v1408_v37 = vsub.f32 1.5, %v1407_v33 }
0x1e7c   : > { %v1372_v42 = vsel %vm1371_vm4, %v1365_v40, 8 }
0x1e7d   : > { %v1373_v44 = vsel %vm1367_vm14, %v1372_v42, 2147483647  ;;  %v1409_v41 = vmul.f32 %v1642_v28, %v1408_v37 }
0x1e7e   : > { %v1375_v45 = vshra.s32 %v1373_v44, 16  ;;  %v1374_v47 = vand.u32 65535, %v1373_v44  ;;  %v1746_v44 = vmov -1.0  }
0x1e80   : > { %v1377_v46 = vcvt.s32.f32 %v1375_v45  ;;  %v1376_v50 = vcvt.s32.f32 %v1374_v47  ;;  %v1413_v47 = vsel %vm1412_vm10, %v1642_v28, %v1409_v41 }
0x1e82   : > { %1378 = vmin.xlane.f32.xlu2 %v1377_v46 }
0x1ef5   : > { %v1379_v48 = vpop.xlane.xlu2 %1378 }
0x1ef6   : > { %vm1380_vm7 = vcmp.eq.f32.partialorder %v1377_v46, %v1379_v48  ;;  %v1385_v56 = vcvt.f32.s32 %v1379_v48 }
0x1ef7   : > { %v1381_v51 = vsel %vm1380_vm7, %v1376_v50, inf }
0x1ef8   : > { %1382 = vmin.xlane.f32.xlu0 %v1381_v51  ;;  %v1386_v59 = vshll.u32 %v1385_v56, 16 }
0x1f6b   : > { %v1383_v58 = vpop.xlane.xlu0 %1382 }
0x1f6c   : > { %v1384_v60 = vcvt.f32.s32 %v1383_v58 }
0x1f6e   : > { %v1387_v49 = vadd.s32 %v1386_v59, %v1384_v60 }
0x1f70   : > { %vm1388_vm8 = vcmp.eq.s32.totalorder %v1365_v40, %v1387_v49  ;;  %v1362_v40 = vand.u32 2147483648, %v1351_v15 }
0x1f71   : > { %v1389_v63 = vsel %vm1388_vm8, %v1961_v36, 0.0 }
0x1f72   : > { %v1390_v0 = vsel %vm1367_vm14, %v1389_v63, 0.0  ;;  %v1363_v42 = vsel %vm1361_vm6, %v1362_v40, %v1360_v38 }
0x1f73   : > { %1391 = vadd.xlane.f32.xlu1 %v1390_v0 }
0x1fe6   : > { %v1392_v39 = vpop.xlane.xlu1 %1391 }
0x1fe7   : > { %vm1393_vm15 = vcmp.ge.f32.partialorder %v1392_v39, 0.0 }
0x1fe8   : > { %v1394_v45 = vsel %vm1393_vm15, 1.0, %v1746_v44 }
0x1fe9   : > { %v1414_v46 = vmul.f32 %v1394_v45, %v1363_v42 }
0x1feb   : > { %v1415_v48 = vmul.f32 %v1414_v46, %v1413_v47 }
0x1fed   : > { %1418 = vperm.xlu2 %1581, %v1415_v48  }
0x2047   : > { %v1419_v50 = vpop.permute.xlu2 %1418 }
0x2048   : > { %v1421_v51 = vmul.f32 %v1419_v50, %v1961_v36 }
0x204a   : > { %1422 = vst.msk [vmem:[%s176_s27] sm:$0x7] %vm1367_vm14, %v1421_v51 }
0x204b PF: > { %p13_p4 = scmp.ge.s32.totalorder %s1805_s21, 6   ;;  %s1999_s9 = smov %s1733_s10 }
0x204c   : > { %s2000_s10 = smov %s1737_s11  ;;  %s2001_s11 = smov %s1815_s24 }
0x204d   : > { %s2002_s12 = smov %s1805_s21  ;;  %15 = sbr.rel (!%p13_p4) target bundleno = 4 (0x4), region = 72 }
0x2052   :  { %1442 = vsyncpa [#allocation3], 1 }
0x2053   :  { %1444 = vsyncpa [#allocation3 + $0x1], 1 }
0x2054   :  { %1445 = vsyncpa [#allocation5], 1 }

</bundles_post_ra>
